<compile_context>
chip_gen: v6e
topology: v6e:2x2x1
jax: 0.10.0
libtpu: 0.0.40
codegen_flags: <defaults>
</compile_context>

<pallas_src>
import jax
import jax.numpy as jnp
from jax.experimental import pallas as pl
from jax.experimental.pallas import tpu as pltpu


def fusion_kernel(qk_ref, qb_ref, cls_ref, ecg_ref, pcg_ref, out_ref):
    qk = qk_ref[...].astype(jnp.float32)       # (bt, D)
    qb = qb_ref[...].astype(jnp.float32)       # (bt, 1)
    cls_tok = cls_ref[...].astype(jnp.float32)  # (bt, D)
    ecg = ecg_ref[...].astype(jnp.float32)      # (bt, D, L)
    pcg = pcg_ref[...].astype(jnp.float32)      # (bt, D, L)

    qk3 = qk[:, :, None]                        # (bt, D, 1)
    qb3 = qb[:, :, None]                        # (bt, 1, 1)

    # Attention scores per modality: s[b, l] = qk[b] . x[b, :, l] + qb[b].
    # Sublane (D-axis) reductions -> XLU; no MXU involvement.
    s_e = jnp.sum(qk3 * ecg, axis=1, keepdims=True) + qb3   # (bt, 1, L)
    s_p = jnp.sum(qk3 * pcg, axis=1, keepdims=True) + qb3   # (bt, 1, L)

    # X' = S_e * ecg + S_p * pcg   (broadcast over channel dim D)
    x_prime = s_e * ecg + s_p * pcg                          # (bt, D, L)

    # S' = q . Wk(X') + q.bk  ==  qk . X' + qb
    s_prime = jnp.sum(qk3 * x_prime, axis=1, keepdims=True) + qb3  # (bt, 1, L)

    # cls' = sum_l S'[l] * X'[:, l]    (lane-axis reduction)
    cls_prime = jnp.sum(s_prime * x_prime, axis=2)           # (bt, D)

    out_ref[...] = 0.5 * cls_tok + 0.5 * cls_prime


_VMEM_BUDGET_BYTES = 36 * 1024 * 1024   # tiles + temporaries target
_VMEM_LIMIT_BYTES = 48 * 1024 * 1024    # scoped limit (safe on v5e/v6e/v7x)


def _plan_batch(batch, d, seq_len, in_itemsize):
    """Pick (padded_batch, block_b): block_b multiple of 8, VMEM-budgeted,
    grid kept >= 2 when batch > 8 (megacore sharding on v7x)."""
    # Per-batch-element VMEM: ecg+pcg double-buffered DMA tiles + ~3 f32
    # (D, L) temporaries in the body + tiny per-row tensors.
    per_elem = (2 * 2 * in_itemsize + 3 * 4) * d * seq_len + 16 * 4 * d
    cap = max(8, (int(_VMEM_BUDGET_BYTES // per_elem) // 8) * 8)
    if batch <= 8:
        block_b = 8
    else:
        half = -(-batch // 2)                       # ceil(B / 2)
        block_b = min(((half + 7) // 8) * 8, cap)   # multiple of 8, <= cap
    padded = -(-batch // block_b) * block_b
    return padded, block_b


def fusion_block(cls_token, ecg_features, pcg_features, wq_t, bq, wk_t, bk):
    """PyTorch layout in/out: cls (B, D, 1), ecg/pcg (B, D, L), out (B, D, 1).

    wq_t / wk_t are the nn.Linear weights pre-transposed to (D, H);
    bq / bk are the (H,) biases.  ecg/pcg may be f32 or bf16.
    """
    B, D, _ = cls_token.shape
    L = ecg_features.shape[2]

    # ---- tiny query-side precompute in plain XLA (hoisted out of the kernel)
    cls2d = cls_token[:, :, 0].astype(jnp.float32)            # (B, D)
    q = cls2d @ wq_t.astype(jnp.float32) + bq.astype(jnp.float32)[None, :]
    qk = q @ wk_t.astype(jnp.float32).T                       # (B, D)
    qb = (q @ bk.astype(jnp.float32))[:, None]                # (B, 1)

    # ---- batch blocking / padding
    in_itemsize = jnp.dtype(ecg_features.dtype).itemsize
    Bp, block_b = _plan_batch(B, D, L, in_itemsize)
    ecg_in, pcg_in = ecg_features, pcg_features
    if Bp != B:
        pad = Bp - B
        cls2d = jnp.pad(cls2d, ((0, pad), (0, 0)))
        qk = jnp.pad(qk, ((0, pad), (0, 0)))
        qb = jnp.pad(qb, ((0, pad), (0, 0)))
        ecg_in = jnp.pad(ecg_in, ((0, pad), (0, 0), (0, 0)))
        pcg_in = jnp.pad(pcg_in, ((0, pad), (0, 0), (0, 0)))
    grid = (Bp // block_b,)

    out2d = pl.pallas_call(
        fusion_kernel,
        out_shape=jax.ShapeDtypeStruct((Bp, D), jnp.float32),
        grid=grid,
        in_specs=[
            pl.BlockSpec((block_b, D), lambda b: (b, 0)),        # qk
            pl.BlockSpec((block_b, 1), lambda b: (b, 0)),        # qb
            pl.BlockSpec((block_b, D), lambda b: (b, 0)),        # cls
            pl.BlockSpec((block_b, D, L), lambda b: (b, 0, 0)),  # ecg
            pl.BlockSpec((block_b, D, L), lambda b: (b, 0, 0)),  # pcg
        ],
        out_specs=pl.BlockSpec((block_b, D), lambda b: (b, 0)),
        compiler_params=pltpu.CompilerParams(
            dimension_semantics=("parallel",),
            vmem_limit_bytes=_VMEM_LIMIT_BYTES),
    )(qk, qb, cls2d, ecg_in, pcg_in)

    out2d = out2d[:B]
    return out2d[:, :, None].astype(cls_token.dtype)             # (B, D, 1)


def fusion_block_ref(cls_token, ecg, pcg, wq_t, bq, wk_t, bk):
    """Pure-JAX reference mirroring the PyTorch forward exactly."""
    q = jnp.einsum('bdo,dh->bho', cls_token, wq_t) + bq[None, :, None]   # (B,H,1)
    comb = jnp.concatenate([ecg, pcg], axis=2)                           # (B,D,2L)
    k = jnp.einsum('bdl,dh->bhl', comb, wk_t) + bk[None, :, None]        # (B,H,2L)
    s = jnp.einsum('bho,bhl->bol', q, k)                                 # (B,1,2L)
    L = ecg.shape[2]
    s = s.reshape(s.shape[0], 2, L)
    s_e, s_p = s[:, 0:1, :], s[:, 1:2, :]
    x_prime = s_e * ecg + s_p * pcg                                      # (B,D,L)
    k_prime = jnp.einsum('bdl,dh->bhl', x_prime, wk_t) + bk[None, :, None]
    s_prime = jnp.einsum('bho,bhl->bol', q, k_prime)                     # (B,1,L)
    cls_prime = jnp.sum(s_prime * x_prime, axis=-1, keepdims=True)       # (B,D,1)
    return 0.5 * cls_token + 0.5 * cls_prime


if __name__ == "__main__":
    D = 32                      # token_dim
    H = D // 2

    key = jax.random.PRNGKey(0)
    k1, k2, k3, k4, k5, k6, k7, k8, k9, k10 = jax.random.split(key, 10)

    # Parameters (Wq: Linear(D, H), Wk: Linear(D, H)), stored as (D, H).
    wq_t = jax.random.normal(k1, (D, H), jnp.float32) * 0.1
    bq = jax.random.normal(k2, (H,), jnp.float32) * 0.1
    wk_t = jax.random.normal(k3, (D, H), jnp.float32) * 0.1
    bk = jax.random.normal(k4, (H,), jnp.float32) * 0.1

    # Case 1: B multiple of 8 (no padding), grid of 2 blocks.
    B, L = 16, 8
    cls_token = jax.random.normal(k5, (B, D, 1), jnp.float32)
    ecg_features = jax.random.normal(k6, (B, D, L), jnp.float32)
    pcg_features = jax.random.normal(k7, (B, D, L), jnp.float32)

    out = fusion_block(cls_token, ecg_features, pcg_features,
                       wq_t, bq, wk_t, bk)
    out = jax.block_until_ready(out)
    ref = fusion_block_ref(cls_token, ecg_features, pcg_features,
                           wq_t, bq, wk_t, bk)
    assert out.shape == (B, D, 1)
    assert jnp.allclose(out, ref, atol=2e-3, rtol=2e-3), (
        float(jnp.max(jnp.abs(out - ref))))

    # Case 2: batch not a multiple of 8 (exercises the padding path).
    B2, L2 = 6, 24
    cls2 = jax.random.normal(k8, (B2, D, 1), jnp.float32)
    ecg2 = jax.random.normal(k9, (B2, D, L2), jnp.float32)
    pcg2 = jax.random.normal(k10, (B2, D, L2), jnp.float32)

    out2 = fusion_block(cls2, ecg2, pcg2, wq_t, bq, wk_t, bk)
    out2 = jax.block_until_ready(out2)
    ref2 = fusion_block_ref(cls2, ecg2, pcg2, wq_t, bq, wk_t, bk)
    assert out2.shape == (B2, D, 1)
    assert jnp.allclose(out2, ref2, atol=2e-3, rtol=2e-3), (
        float(jnp.max(jnp.abs(out2 - ref2))))

    print("KERNEL_OK")
</pallas_src>

<mosaic_0001>
module attributes {stable_mosaic.version = 11 : i64} {
  func.func @fusion_kernel(%arg0: i32, %arg1: memref<8x32xf32, #tpu.memory_space<vmem>>, %arg2: memref<8x1xf32, #tpu.memory_space<vmem>>, %arg3: memref<8x32xf32, #tpu.memory_space<vmem>>, %arg4: memref<8x32x8xf32, #tpu.memory_space<vmem>>, %arg5: memref<8x32x8xf32, #tpu.memory_space<vmem>>, %arg6: memref<8x32xf32, #tpu.memory_space<vmem>>) attributes {dimension_semantics = [#tpu.dimension_semantics<parallel>], iteration_bounds = array<i64: 2>, scalar_prefetch = 0 : i64, scratch_operands = 0 : i64, tpu.core_type = #tpu.core_type<tc>, window_params = [{transform_indices = @transform_0, window_bounds = array<i64: 8, 32>}, {transform_indices = @transform_1, window_bounds = array<i64: 8, 1>}, {transform_indices = @transform_2, window_bounds = array<i64: 8, 32>}, {transform_indices = @transform_3, window_bounds = array<i64: 8, 32, 8>}, {transform_indices = @transform_4, window_bounds = array<i64: 8, 32, 8>}, {transform_indices = @transform_5, window_bounds = array<i64: 8, 32>}]} {
    %c0 = arith.constant 0 : index
    %c0_0 = arith.constant 0 : index
    %0 = vector.load %arg1[%c0, %c0_0] : memref<8x32xf32, #tpu.memory_space<vmem>>, vector<8x32xf32>
    %c0_1 = arith.constant 0 : index
    %c0_2 = arith.constant 0 : index
    %1 = vector.load %arg2[%c0_1, %c0_2] : memref<8x1xf32, #tpu.memory_space<vmem>>, vector<8x1xf32>
    %c0_3 = arith.constant 0 : index
    %c0_4 = arith.constant 0 : index
    %2 = vector.load %arg3[%c0_3, %c0_4] : memref<8x32xf32, #tpu.memory_space<vmem>>, vector<8x32xf32>
    %c0_5 = arith.constant 0 : index
    %c0_6 = arith.constant 0 : index
    %c0_7 = arith.constant 0 : index
    %3 = vector.load %arg4[%c0_5, %c0_6, %c0_7] : memref<8x32x8xf32, #tpu.memory_space<vmem>>, vector<8x32x8xf32>
    %c0_8 = arith.constant 0 : index
    %c0_9 = arith.constant 0 : index
    %c0_10 = arith.constant 0 : index
    %4 = vector.load %arg5[%c0_8, %c0_9, %c0_10] : memref<8x32x8xf32, #tpu.memory_space<vmem>>, vector<8x32x8xf32>
    %5 = vector.shape_cast %0 : vector<8x32xf32> to vector<8x32x1xf32>
    %6 = vector.shape_cast %1 : vector<8x1xf32> to vector<8x1x1xf32>
    %7 = vector.broadcast %5 : vector<8x32x1xf32> to vector<8x32x8xf32>
    %8 = arith.mulf %7, %3 : vector<8x32x8xf32>
    %cst = arith.constant dense<0.000000e+00> : vector<8x8xf32>
    %9 = vector.multi_reduction <add>, %8, %cst [1] : vector<8x32x8xf32> to vector<8x8xf32>
    %10 = vector.shape_cast %9 : vector<8x8xf32> to vector<8x1x8xf32>
    %11 = vector.broadcast %6 : vector<8x1x1xf32> to vector<8x1x8xf32>
    %12 = arith.addf %10, %11 : vector<8x1x8xf32>
    %13 = vector.broadcast %5 : vector<8x32x1xf32> to vector<8x32x8xf32>
    %14 = arith.mulf %13, %4 : vector<8x32x8xf32>
    %cst_11 = arith.constant dense<0.000000e+00> : vector<8x8xf32>
    %15 = vector.multi_reduction <add>, %14, %cst_11 [1] : vector<8x32x8xf32> to vector<8x8xf32>
    %16 = vector.shape_cast %15 : vector<8x8xf32> to vector<8x1x8xf32>
    %17 = vector.broadcast %6 : vector<8x1x1xf32> to vector<8x1x8xf32>
    %18 = arith.addf %16, %17 : vector<8x1x8xf32>
    %19 = vector.broadcast %12 : vector<8x1x8xf32> to vector<8x32x8xf32>
    %20 = arith.mulf %19, %3 : vector<8x32x8xf32>
    %21 = vector.broadcast %18 : vector<8x1x8xf32> to vector<8x32x8xf32>
    %22 = arith.mulf %21, %4 : vector<8x32x8xf32>
    %23 = arith.addf %20, %22 : vector<8x32x8xf32>
    %24 = vector.broadcast %5 : vector<8x32x1xf32> to vector<8x32x8xf32>
    %25 = arith.mulf %24, %23 : vector<8x32x8xf32>
    %cst_12 = arith.constant dense<0.000000e+00> : vector<8x8xf32>
    %26 = vector.multi_reduction <add>, %25, %cst_12 [1] : vector<8x32x8xf32> to vector<8x8xf32>
    %27 = vector.shape_cast %26 : vector<8x8xf32> to vector<8x1x8xf32>
    %28 = vector.broadcast %6 : vector<8x1x1xf32> to vector<8x1x8xf32>
    %29 = arith.addf %27, %28 : vector<8x1x8xf32>
    %30 = vector.broadcast %29 : vector<8x1x8xf32> to vector<8x32x8xf32>
    %31 = arith.mulf %30, %23 : vector<8x32x8xf32>
    %cst_13 = arith.constant dense<0.000000e+00> : vector<8x32xf32>
    %32 = vector.multi_reduction <add>, %31, %cst_13 [2] : vector<8x32x8xf32> to vector<8x32xf32>
    %cst_14 = arith.constant 5.000000e-01 : f32
    %33 = vector.broadcast %cst_14 : f32 to vector<8x32xf32>
    %34 = arith.mulf %33, %2 : vector<8x32xf32>
    %cst_15 = arith.constant 5.000000e-01 : f32
    %35 = vector.broadcast %cst_15 : f32 to vector<8x32xf32>
    %36 = arith.mulf %35, %32 : vector<8x32xf32>
    %37 = arith.addf %34, %36 : vector<8x32xf32>
    %c0_16 = arith.constant 0 : index
    %c0_17 = arith.constant 0 : index
    %38 = vector.load %arg6[%c0_16, %c0_17] : memref<8x32xf32, #tpu.memory_space<vmem>>, vector<8x32xf32>
    tpu.vector_store %arg6[%c0_16, %c0_17], %37 {strides = array<i32>} : memref<8x32xf32, #tpu.memory_space<vmem>>, vector<8x32xf32>,
    return
  }
  func.func @transform_0(%arg0: i32) -> (i32, i32) {
    %c0_i32 = arith.constant 0 : i32
    %c0_i32_0 = arith.constant 0 : i32
    return %arg0, %c0_i32 : i32, i32
  }
  func.func @transform_1(%arg0: i32) -> (i32, i32) {
    %c0_i32 = arith.constant 0 : i32
    %c0_i32_0 = arith.constant 0 : i32
    return %arg0, %c0_i32 : i32, i32
  }
  func.func @transform_2(%arg0: i32) -> (i32, i32) {
    %c0_i32 = arith.constant 0 : i32
    %c0_i32_0 = arith.constant 0 : i32
    return %arg0, %c0_i32 : i32, i32
  }
  func.func @transform_3(%arg0: i32) -> (i32, i32, i32) {
    %c0_i32 = arith.constant 0 : i32
    %c0_i32_0 = arith.constant 0 : i32
    %c0_i32_1 = arith.constant 0 : i32
    return %arg0, %c0_i32, %c0_i32_0 : i32, i32, i32
  }
  func.func @transform_4(%arg0: i32) -> (i32, i32, i32) {
    %c0_i32 = arith.constant 0 : i32
    %c0_i32_0 = arith.constant 0 : i32
    %c0_i32_1 = arith.constant 0 : i32
    return %arg0, %c0_i32, %c0_i32_0 : i32, i32, i32
  }
  func.func @transform_5(%arg0: i32) -> (i32, i32) {
    %c0_i32 = arith.constant 0 : i32
    %c0_i32_0 = arith.constant 0 : i32
    return %arg0, %c0_i32 : i32, i32
  }
}

</mosaic_0001>

<bundles_post_ra>
// kernel: tpu_custom_call.1
= control target key start
LH: loop header
LB: loop body
LE: loop exit
PB: predicated region body
PF: predicated region fallthrough
CT: control target
= control target key end

     0   :  { %10 = vsyncpa [#allocation3], 0  ;;  %s3020_s0 = inlined_call_operand.vmem [shape: f32[16,32], index: 0, kind: input, shape index: {}]   ;;  %s3021_s1 = inlined_call_operand.vmem [shape: f32[16,1], index: 1, kind: input, shape index: {}]   ;;  %s3022_s2 = inlined_call_operand.vmem [shape: f32[16,32], index: 2, kind: input, shape index: {}]   ;;  %s3023_s3 = inlined_call_operand.vmem [shape: f32[16,32,8], index: 3, kind: input, shape index: {}]   ;;  %s3024_s4 = inlined_call_operand.vmem [shape: f32[16,32,8], index: 4, kind: input, shape index: {}]   ;;  %s3025_s5 = inlined_call_operand.hbm [shape: f32[16,32], index: 5, kind: output, shape index: {}]  }
   0x1   :  { %12 = vsyncpa [#allocation3 + $0x1], 0  ;;  %s1817_s18 = smov 0   ;;  %s1819_s19 = smov 0  }
   0x2   :  { %s1821_s20 = smov 0   ;;  %s1823_s21 = smov 0  }
   0x3 LB: > { %s1838_s22 = sadd.s32 4294967295, %s1782_s21   ;;  %s1658_s23 = sadd.s32 4294967294, %s1782_s21   ;;  %s1782_s21 = sphi %s1823_s21, %s3283_s21   ;;  %s1778_s20 = sphi %s1821_s20, %s3282_s20   ;;  %s1774_s19 = sphi %s1819_s19, %s3281_s19   ;;  %s1770_s18 = sphi %s1817_s18, %s3280_s18  }
   0x4   : > { %s1842_s24 = sadd.s32 1, %s1782_s21   ;;  %s155_s25 = sadd.s32 1, %s1778_s20 }
   0x5   : > { %s152_s26 = ssub.s32 %s1782_s21, %s1842_s24  ;;  %p165_p0 = scmp.ne.s32.totalorder %s1778_s20, %s1774_s19 }
   0x6   : > { %p153_p1 = scmp.eq.s32.totalorder %s152_s26, 0  ;;  %p166_p2 = scmp.eq.s32.totalorder %s1838_s22, 1 }
   0x7   : > { %p171_p3 = scmp.ne.s32.totalorder %s1774_s19, %s1770_s18  ;;  %p172_p4 = scmp.eq.s32.totalorder %s1658_s23, 1 }
   0x8   : > { %s1853_s27 = scalar_select %p153_p1, %s1778_s20, %s155_s25  }
   0x9   : > { %p1855_p5 = por %p166_p2, %p165_p0  ;;  %p1859_p6 = por %p172_p4, %p171_p3 }
   0xa   : > { %p1661_p7 = scmp.ge.s32.totalorder %s1782_s21, 1  ;;  %p231_p8 = scmp.lt.s32.totalorder %s1782_s21, 3 }
   0xc   : > { %p232_p9 = pnand %p1661_p7, %p231_p8 }
   0xe   : > { %235 = sbr.rel (%p232_p9) target bundleno = 491 (0x1eb), region = 40 }
  0x13   : > { %p278_p10 = scmp.lt.s32.totalorder %s1838_s22, 1  ;;  %v3026_v0 = vlaneseq  ;;  %v1784_v1 = vmov 0   ;;  %v1785_v19 = vmov 1966171168   ;;  %s1666_s13 = sshll.u32 %s1838_s22, 3  ;;  %vm605_vm0 = vcmask 64512  }
  0x14   : > { %1720 = vset.pattern.permute.xlu1 %v1784_v1  ;;  %1719 = vset.pattern.permute.xlu0 %v1784_v1  ;;  %v526_v20 = vunpack.c.l.s4 %v1785_v19  ;;  %p291_p11 = scmp.lt.s32.totalorder %s1666_s13, 15  ;;  %vm1370_vm1 = vcmask 130112   ;;  %vm1377_vm2 = vcmask 195712   ;;  %vm1384_vm3 = vcmask 261312  }
  0x15   : > { %s279_s30 = scalar_select %p278_p10, %s1838_s22, 1  ;;  %v1868_v2 = vshrl.u32 %v3026_v0, 7  ;;  %vm1519_vm4 = vcmask 1041409   ;;  %vm1521_vm5 = vcmask 1042434   ;;  %vm1523_vm6 = vcmask 1043459  }
  0x16   : > { %v527_v22 = vunpack.c.0.s8 %v526_v20  ;;  %s3285_s13 = smov (!%p291_p11, %s1666_s13), 15  ;;  %vm1525_vm7 = vcmask 1044484   ;;  %vm1527_vm8 = vcmask 1045509   ;;  %vm1529_vm9 = vcmask 1046534  }
  0x17   : > { %3112 = vst [vmem:[#allocation5_spill] sm:$0xff] %v1868_v2  ;;  %s1870_s6 = sshll.u32 %s279_s30, 3  ;;  %v392_v3 = vsub.s32 1, %v1868_v2  ;;  %v1874_v4 = vsub.s32 0, %v1868_v2  ;;  %v411_v8 = vsub.s32 2, %v1868_v2  ;;  %v430_v10 = vsub.s32 3, %v1868_v2 }
  0x18   : > { %s281_s9 = scalar_lea.vmem %s3020_s0, %s1870_s6  ;;  %v449_v12 = vsub.s32 4, %v1868_v2  ;;  %v468_v14 = vsub.s32 5, %v1868_v2  ;;  %v487_v16 = vsub.s32 6, %v1868_v2  ;;  %v506_v18 = vsub.s32 7, %v1868_v2  ;;  %s285_s12 = scalar_lea.vmem %s3021_s1, %s1870_s6 }
  0x19   : > { %v304_v5 = vld [vmem:[%s281_s9] sm:$0xff]  ;;  %v530_v23 = vsub.s32 %v527_v22, %v1868_v2  ;;  %s1676_s14 = sshll.u32 %s3285_s13, 5  ;;  %s275_s30 = sand.u32 1, %s1774_s19   ;;  %vm1531_vm10 = vcmask 1047559   ;;  %vm1535_vm11 = vcmask 261120  }
  0x1a   : > { %v393_v6 = vrot.slane %v304_v5, %v392_v3  ;;  %v374_v7 = vrot.slane %v304_v5, %v1874_v4  ;;  %v412_v9 = vrot.slane %v304_v5, %v411_v8  ;;  %v431_v11 = vrot.slane %v304_v5, %v430_v10  ;;  %v305_v24 = vld [vmem:[%s285_s12] sm:$0xff]  ;;  %s1904_s17 = scalar_lea.vmem %s3023_s3, %s1676_s14  ;;  %s1913_s26 = scalar_lea.vmem %s3024_s4, %s1676_s14 }
  0x1b   : > { %v450_v13 = vrot.slane %v304_v5, %v449_v12  ;;  %v469_v15 = vrot.slane %v304_v5, %v468_v14  ;;  %v488_v17 = vrot.slane %v304_v5, %v487_v16  ;;  %v507_v21 = vrot.slane %v304_v5, %v506_v18  ;;  %v1916_v44 = vld [vmem:[%s1904_s17 + $0x20] sm:$0xff]  ;;  %v1922_v46 = vld [vmem:[%s1904_s17 + $0x28] sm:$0xff]  ;;  %v1954_v59 = vld [vmem:[%s1904_s17 + $0x30] sm:$0xff]  ;;  %s289_s9 = scalar_lea.vmem %s3022_s2, %s1870_s6  ;;  %s2962_s10 = sshll.u32 %s275_s30, 3 }
  0x1c   : > { %395 = vbcast.lane.b32.xlu1 %v393_v6, 256  ;;  %376 = vbcast.lane.b32.xlu0 %v374_v7, 256  ;;  %v531_v25 = vrot.slane %v305_v24, %v530_v23  ;;  %v524_v27 = vcombine.high %v305_v24, %v305_v24  ;;  %3119 = vst [vmem:[#allocation12_spill] sm:$0xff] %v1916_v44  ;;  %v1919_v45 = vld [vmem:[%s1913_s26 + $0x20] sm:$0xff]  ;;  %v1925_v47 = vld [vmem:[%s1913_s26 + $0x28] sm:$0xff]  ;;  %v1957_v60 = vld [vmem:[%s1913_s26 + $0x30] sm:$0xff] }
  0x1d   : > { %3120 = vst [vmem:[#allocation13_spill] sm:$0xff] %v1919_v45  ;;  %v1928_v48 = vld [vmem:[%s1904_s17 + $0x8] sm:$0xff]  ;;  %v1942_v54 = vld [vmem:[%s1904_s17] sm:$0xff]  ;;  %v1960_v61 = vld [vmem:[%s1904_s17 + $0x10] sm:$0xff]  ;;  %s1673_s6 = sshll.u32 %s1838_s22, 7  ;;  %s277_s11 = scalar_lea.vmem [#allocation2], %s2962_s10 }
  0x1e   : > { %v539_v26 = vcombine.high %v531_v25, %v531_v25  ;;  %v547_v29 = vrot.slane %v531_v25, %v530_v23  ;;  %v538_v30 = vrot.slane %v524_v27, %v530_v23  ;;  %3121 = vst [vmem:[#allocation14_spill] sm:$0xff] %v1928_v48  ;;  %v1933_v50 = vld [vmem:[%s1913_s26 + $0x8] sm:$0xff]  ;;  %v1945_v55 = vld [vmem:[%s1913_s26] sm:$0xff]  ;;  %v1965_v63 = vld [vmem:[%s1913_s26 + $0x10] sm:$0xff]  ;;  %s1551_s12 = sshll.u32 %s277_s11, 4  ;;  %s1549_s15 = scalar_lea.hbm %s3025_s5, %s1673_s6  ;;  %s1552_s12 = int_to_ptr.vmem [resolvable:$true] %s1551_s12 }
  0x1f   : > { %3122 = vst [vmem:[#allocation15_spill] sm:$0xff] %v1933_v50  ;;  %v1979_v8 = vld [vmem:[%s1904_s17 + $0x40] sm:$0xff]  ;;  %v2012_v27 = vld [vmem:[%s1904_s17 + $0x68] sm:$0xff]  ;;  %s1538_s16 = scalar_lea.sflag [#allocation3], %s275_s30  ;;  %s1786_s22 = smov [#allocation2]  }
  0x20   : > { %399 = vbcast.lane.b32.xlu1 %v393_v6, 264  ;;  %380 = vbcast.lane.b32.xlu0 %v374_v7, 264  ;;  %v561_v28 = vrot.slane %v539_v26, %v530_v23  ;;  %v569_v31 = vcombine.high %v547_v29, %v547_v29  ;;  %v540_v33 = vcombine.high %v538_v30, %v538_v30  ;;  %v1987_v12 = vld [vmem:[%s1913_s26 + $0x40] sm:$0xff]  ;;  %s1726_s23 = sshll.u32 %s1786_s22, 4  ;;  %s1727_s23 = int_to_ptr.vmem [resolvable:$false] %s1726_s23 }
  0x21   : > { %v554_v34 = vrot.slane %v538_v30, %v530_v23  ;;  %3126 = vst [vmem:[#allocation19_spill] sm:$0xff] %v1979_v8  ;;  %3129 = vst [vmem:[#allocation22_spill] sm:$0xff] %v1987_v12  ;;  %s1728_s25 = scalar_lea.vmem %s1727_s23, 256  ;;  %p1729_p1 = scmp.lt.s32.totalorder %s1552_s12, %s1727_s23 }
  0x22   : > { %v571_v32 = vcombine.high %v561_v28, %v561_v28  ;;  %v568_v35 = vrot.slane %v540_v33, %v530_v23  ;;  %3130 = vst [vmem:[#allocation23_spill] sm:$0xff] %v2012_v27 }
  0x23   : > { %v570_v36 = vcombine.high %v554_v34, %v554_v34 }
  0x24   : > { %418 = vbcast.lane.b32.xlu1 %v412_v9, 264  ;;  %414 = vbcast.lane.b32.xlu0 %v412_v9, 256  ;;  %v572_v37 = vcombine.high %v568_v35, %v568_v35 }
  0x28   : > { %403 = vbcast.lane.b32.xlu1 %v393_v6, 272  ;;  %384 = vbcast.lane.b32.xlu0 %v374_v7, 272 }
  0x2c   : > { %437 = vbcast.lane.b32.xlu1 %v431_v11, 264  ;;  %433 = vbcast.lane.b32.xlu0 %v431_v11, 256 }
  0x30   : > { %452 = vbcast.lane.b32.xlu1 %v450_v13, 256  ;;  %422 = vbcast.lane.b32.xlu0 %v412_v9, 272 }
  0x34   : > { %388 = vbcast.lane.b32.xlu1 %v374_v7, 280  ;;  %456 = vbcast.lane.b32.xlu0 %v450_v13, 264  ;;  %v1976_v7 = vld [vmem:[%s1913_s26 + $0x48] sm:$0xff] }
  0x35   : > { %3125 = vst [vmem:[#allocation18_spill] sm:$0xff] %v1976_v7 }
  0x38   : > { %441 = vbcast.lane.b32.xlu1 %v431_v11, 272  ;;  %407 = vbcast.lane.b32.xlu0 %v393_v6, 280  ;;  %v1973_v6 = vld [vmem:[%s1904_s17 + $0x48] sm:$0xff] }
  0x3c   : > { %475 = vbcast.lane.b32.xlu1 %v469_v15, 264  ;;  %471 = vbcast.lane.b32.xlu0 %v469_v15, 256 }
  0x40   : > { %460 = vbcast.lane.b32.xlu1 %v450_v13, 272  ;;  %426 = vbcast.lane.b32.xlu0 %v412_v9, 280 }
  0x44   : > { %494 = vbcast.lane.b32.xlu1 %v488_v17, 264  ;;  %490 = vbcast.lane.b32.xlu0 %v488_v17, 256 }
  0x48   : > { %479 = vbcast.lane.b32.xlu1 %v469_v15, 272  ;;  %445 = vbcast.lane.b32.xlu0 %v431_v11, 280 }
  0x4c   : > { %513 = vbcast.lane.b32.xlu1 %v507_v21, 264  ;;  %509 = vbcast.lane.b32.xlu0 %v507_v21, 256 }
  0x50   : > { %498 = vbcast.lane.b32.xlu1 %v488_v17, 272  ;;  %464 = vbcast.lane.b32.xlu0 %v450_v13, 280 }
  0x54   : > { %517 = vbcast.lane.b32.xlu1 %v507_v21, 272  ;;  %483 = vbcast.lane.b32.xlu0 %v469_v15, 280 }
  0x58   : > { %521 = vbcast.lane.b32.xlu1 %v507_v21, 280  ;;  %502 = vbcast.lane.b32.xlu0 %v488_v17, 280 }
  0x5c   : > { %719 = vperm.xlu1 %1720, %v561_v28   ;;  %711 = vperm.xlu0 %1719, %v547_v29  }
  0x60   : > { %727 = vperm.xlu1 %1720, %v569_v31   ;;  %735 = vperm.xlu0 %1719, %v571_v32  }
  0x64   : > { %743 = vperm.xlu1 %1720, %v554_v34   ;;  %751 = vperm.xlu0 %1719, %v568_v35   ;;  %v2022_v34 = vld [vmem:[%s1913_s26 + $0x68] sm:$0xff] }
  0x65   : > { %3133 = vst [vmem:[#allocation26_spill] sm:$0xff] %v2022_v34 }
  0x68   : > { %759 = vperm.xlu1 %1720, %v570_v36   ;;  %767 = vperm.xlu0 %1719, %v572_v37  }
  0x8e   : > { %v1893_v38 = vpop.permute.xlu1 %395  ;;  %v1895_v39 = vpop.permute.xlu0 %376 }
  0x8f   : > { %3113 = vst [vmem:[#allocation6_spill] sm:$0xff] %v1893_v38  ;;  %3114 = vst [vmem:[#allocation7_spill] sm:$0xff] %v1895_v39  ;;  %v577_v49 = vmul.f32 %v1893_v38, %v1916_v44  ;;  %v786_v53 = vmul.f32 %v1893_v38, %v1919_v45  ;;  %v573_v3 = vmul.f32 %v1895_v39, %v1942_v54  ;;  %v2113_v38 = vld [vmem:[%s1913_s26 + $0x70] sm:$0xff]  ;;  %v2133_v45 = vld [vmem:[%s1913_s26 + $0xa8] sm:$0xff] }
  0x90   : > { %v782_v5 = vmul.f32 %v1895_v39, %v1945_v55  ;;  %3147 = vst [vmem:[#allocation40_spill] sm:$0xff] %v2133_v45  ;;  %v2139_v39 = vld [vmem:[%s1904_s17 + $0x58] sm:$0xff] }
  0x91   : > { %v619_v1 = vsel %vm605_vm0, %v577_v49, 0.0  ;;  %v827_v11 = vsel %vm605_vm0, %v786_v53, 0.0  ;;  %v606_v24 = vsel %vm605_vm0, %v573_v3, 0.0  ;;  %v2026_v53 = vld [vmem:[%s1904_s17 + $0x60] sm:$0xff] }
  0x92   : > { %v1897_v40 = vpop.permute.xlu1 %399  ;;  %v1899_v41 = vpop.permute.xlu0 %380  ;;  %v814_v25 = vsel %vm605_vm0, %v782_v5, 0.0  ;;  %3134 = vst [vmem:[#allocation27_spill] sm:$0xff] %v2026_v53  ;;  %v2040_v5 = vld [vmem:[%s1913_s26 + $0x60] sm:$0xff] }
  0x93   : > { %3115 = vst [vmem:[#allocation8_spill] sm:$0xff] %v1897_v40  ;;  %3116 = vst [vmem:[#allocation9_spill] sm:$0xff] %v1899_v41  ;;  %v578_v56 = vmul.f32 %v1897_v40, %v1922_v46  ;;  %v787_v57 = vmul.f32 %v1897_v40, %v1925_v47  ;;  %v574_v58 = vmul.f32 %v1899_v41, %v1928_v48 }
  0x94   : > { %v783_v62 = vmul.f32 %v1899_v41, %v1933_v50  ;;  %3135 = vst [vmem:[#allocation28_spill] sm:$0xff] %v2040_v5 }
  0x95   : > { %v620_v16 = vsel %vm605_vm0, %v578_v56, 0.0  ;;  %v828_v17 = vsel %vm605_vm0, %v787_v57, 0.0  ;;  %v607_v18 = vsel %vm605_vm0, %v574_v58, 0.0  ;;  %v2029_v56 = vld [vmem:[%s1904_s17 + $0x18] sm:$0xff] }
  0x96   : > { %v1906_v42 = vpop.permute.xlu1 %418  ;;  %v1908_v43 = vpop.permute.xlu0 %414  ;;  %v815_v20 = vsel %vm605_vm0, %v783_v62, 0.0  ;;  %v621_v30 = vadd.f32 %v620_v16, %v619_v1  ;;  %v829_v35 = vadd.f32 %v828_v17, %v827_v11  ;;  %v608_v36 = vadd.f32 %v607_v18, %v606_v24  ;;  %v2032_v57 = vld [vmem:[%s1913_s26 + $0x18] sm:$0xff]  ;;  %v2043_v11 = vld [vmem:[%s1904_s17 + $0x80] sm:$0xff]  ;;  %v2050_v18 = vld [vmem:[%s1904_s17 + $0x50] sm:$0xff] }
  0x97   : > { %3117 = vst [vmem:[#allocation10_spill] sm:$0xff] %v1906_v42  ;;  %3118 = vst [vmem:[#allocation11_spill] sm:$0xff] %v1908_v43  ;;  %v582_v21 = vmul.f32 %v1906_v42, %v1973_v6  ;;  %v791_v22 = vmul.f32 %v1906_v42, %v1976_v7  ;;  %v581_v23 = vmul.f32 %v1908_v43, %v1979_v8 }
  0x98   : > { %v790_v26 = vmul.f32 %v1908_v43, %v1987_v12  ;;  %v816_v37 = vadd.f32 %v815_v20, %v814_v25  ;;  %3136 = vst [vmem:[#allocation29_spill] sm:$0xff] %v2043_v11 }
  0x99   : > { %v633_v58 = vsel %vm605_vm0, %v582_v21, 0.0  ;;  %v841_v62 = vsel %vm605_vm0, %v791_v22, 0.0  ;;  %v632_v1 = vsel %vm605_vm0, %v581_v23, 0.0  ;;  %v2059_v23 = vld [vmem:[%s1913_s26 + $0x50] sm:$0xff] }
  0x9a   : > { %v1935_v51 = vpop.permute.xlu1 %403  ;;  %v1937_v52 = vpop.permute.xlu0 %384  ;;  %v634_v8 = vadd.f32 %v633_v58, %v632_v1 }
  0x9b   : > { %3123 = vst [vmem:[#allocation16_spill] sm:$0xff] %v1935_v51  ;;  %3124 = vst [vmem:[#allocation17_spill] sm:$0xff] %v1937_v52  ;;  %v579_v13 = vmul.f32 %v1935_v51, %v1954_v59  ;;  %v788_v14 = vmul.f32 %v1935_v51, %v1957_v60  ;;  %v575_v15 = vmul.f32 %v1937_v52, %v1960_v61  ;;  %v2130_v51 = vld [vmem:[%s1904_s17 + $0xa8] sm:$0xff] }
  0x9c   : > { %v784_v19 = vmul.f32 %v1937_v52, %v1965_v63  ;;  %3146 = vst [vmem:[#allocation39_spill] sm:$0xff] %v2130_v51 }
  0x9d   : > { %v622_v31 = vsel %vm605_vm0, %v579_v13, 0.0  ;;  %v830_v32 = vsel %vm605_vm0, %v788_v14, 0.0  ;;  %v609_v33 = vsel %vm605_vm0, %v575_v15, 0.0  ;;  %v2046_v13 = vld [vmem:[%s1913_s26 + $0x80] sm:$0xff]  ;;  %v840_v14 = vsel %vm605_vm0, %v790_v26, 0.0  ;;  %v2066_v26 = vld [vmem:[%s1904_s17 + $0x88] sm:$0xff] }
  0x9e   : > { %v1981_v9 = vpop.permute.xlu1 %437  ;;  %v1983_v10 = vpop.permute.xlu0 %433  ;;  %v817_v49 = vsel %vm605_vm0, %v784_v19, 0.0  ;;  %3137 = vst [vmem:[#allocation30_spill] sm:$0xff] %v2046_v13  ;;  %v623_v15 = vadd.f32 %v622_v31, %v621_v30  ;;  %v831_v16 = vadd.f32 %v830_v32, %v829_v35  ;;  %v610_v17 = vadd.f32 %v609_v33, %v608_v36  ;;  %3140 = vst [vmem:[#allocation33_spill] sm:$0xff] %v2066_v26  ;;  %v2069_v30 = vld [vmem:[%s1913_s26 + $0x88] sm:$0xff]  ;;  %v2080_v36 = vld [vmem:[%s1904_s17 + $0x38] sm:$0xff] }
  0x9f   : > { %3127 = vst [vmem:[#allocation20_spill] sm:$0xff] %v1981_v9  ;;  %3128 = vst [vmem:[#allocation21_spill] sm:$0xff] %v1983_v10  ;;  %v586_v3 = vmul.f32 %v1981_v9, %v2012_v27  ;;  %v818_v21 = vadd.f32 %v817_v49, %v816_v37  ;;  %v795_v22 = vmul.f32 %v1981_v9, %v2022_v34  ;;  %v2083_v37 = vld [vmem:[%s1913_s26 + $0x38] sm:$0xff] }
  0xa0   : > { %3141 = vst [vmem:[#allocation34_spill] sm:$0xff] %v2069_v30  ;;  %v585_v31 = vmul.f32 %v1983_v10, %v2026_v53  ;;  %v794_v32 = vmul.f32 %v1983_v10, %v2040_v5  ;;  %v2102_v53 = vld [vmem:[%s1904_s17 + $0x70] sm:$0xff] }
  0xa1   : > { %v646_v49 = vsel %vm605_vm0, %v586_v3, 0.0  ;;  %v854_v43 = vsel %vm605_vm0, %v795_v22, 0.0 }
  0xa2   : > { %v2014_v28 = vpop.permute.xlu1 %452  ;;  %v2016_v29 = vpop.permute.xlu0 %422  ;;  %v853_v42 = vsel %vm605_vm0, %v794_v32, 0.0 }
  0xa3   : > { %3131 = vst [vmem:[#allocation24_spill] sm:$0xff] %v2014_v28  ;;  %3132 = vst [vmem:[#allocation25_spill] sm:$0xff] %v2016_v29  ;;  %v589_v33 = vmul.f32 %v2014_v28, %v2043_v11  ;;  %v798_v35 = vmul.f32 %v2014_v28, %v2046_v13  ;;  %v583_v0 = vmul.f32 %v2016_v29, %v2050_v18 }
  0xa4   : > { %v792_v11 = vmul.f32 %v2016_v29, %v2059_v23  ;;  %v855_v44 = vadd.f32 %v854_v43, %v853_v42 }
  0xa5   : > { %v866_v29 = vsel %vm605_vm0, %v798_v35, 0.0 }
  0xa6   : > { %v2052_v19 = vpop.permute.xlu1 %388  ;;  %v2054_v20 = vpop.permute.xlu0 %456 }
  0xa7   : > { %3138 = vst [vmem:[#allocation31_spill] sm:$0xff] %v2052_v19  ;;  %3139 = vst [vmem:[#allocation32_spill] sm:$0xff] %v2054_v20  ;;  %v576_v24 = vmul.f32 %v2052_v19, %v2029_v56  ;;  %v785_v25 = vmul.f32 %v2052_v19, %v2032_v57  ;;  %v590_v28 = vmul.f32 %v2054_v20, %v2066_v26  ;;  %v2250_v26 = vld [vmem:[%s1913_s26 + $0xe8] sm:$0xff] }
  0xa8   : > { %v799_v13 = vmul.f32 %v2054_v20, %v2069_v30  ;;  %v658_v20 = vsel %vm605_vm0, %v589_v33, 0.0  ;;  %v2136_v30 = vld [vmem:[%s1904_s17 + $0xa0] sm:$0xff]  ;;  %3167 = vst [vmem:[#allocation60_spill] sm:$0xff] %v2250_v26 }
  0xa9   : > { %v611_v2 = vsel %vm605_vm0, %v576_v24, 0.0  ;;  %v819_v10 = vsel %vm605_vm0, %v785_v25, 0.0  ;;  %3148 = vst [vmem:[#allocation41_spill] sm:$0xff] %v2136_v30 }
  0xaa   : > { %v612_v9 = vadd.f32 %v611_v2, %v610_v17  ;;  %v2096_v5 = vpop.permute.xlu1 %441  ;;  %v2098_v3 = vpop.permute.xlu0 %407  ;;  %v820_v24 = vadd.f32 %v819_v10, %v818_v21  ;;  %v645_v17 = vsel %vm605_vm0, %v585_v31, 0.0  ;;  %v635_v10 = vsel %vm605_vm0, %v583_v0, 0.0 }
  0xab   : > { %3142 = vst [vmem:[#allocation35_spill] sm:$0xff] %v2096_v5  ;;  %3143 = vst [vmem:[#allocation36_spill] sm:$0xff] %v2098_v3  ;;  %v580_v25 = vmul.f32 %v2098_v3, %v2080_v36  ;;  %v789_v2 = vmul.f32 %v2098_v3, %v2083_v37  ;;  %v843_v3 = vsel %vm605_vm0, %v792_v11, 0.0  ;;  %v659_v31 = vsel %vm605_vm0, %v590_v28, 0.0 }
  0xac   : > { %v613_v21 = vrot.slane %v612_v9, 4  ;;  %v867_v32 = vsel %vm605_vm0, %v799_v13, 0.0  ;;  %v587_v33 = vmul.f32 %v2096_v5, %v2102_v53  ;;  %v842_v28 = vadd.f32 %v841_v62, %v840_v14  ;;  %v2145_v14 = vld [vmem:[%s1913_s26 + $0xa0] sm:$0xff] }
  0xad   : > { %v624_v22 = vsel %vm605_vm0, %v580_v25, 0.0  ;;  %v832_v12 = vsel %vm605_vm0, %v789_v2, 0.0  ;;  %v821_v25 = vrot.slane %v820_v24, 4  ;;  %v796_v2 = vmul.f32 %v2096_v5, %v2113_v38  ;;  %3149 = vst [vmem:[#allocation42_spill] sm:$0xff] %v2145_v14 }
  0xae   : > { %v2123_v35 = vpop.permute.xlu1 %475  ;;  %v2125_v0 = vpop.permute.xlu0 %471  ;;  %v625_v40 = vadd.f32 %v624_v22, %v623_v15  ;;  %v833_v11 = vadd.f32 %v832_v12, %v831_v16  ;;  %v647_v13 = vadd.f32 %v646_v49, %v645_v17  ;;  %v614_v19 = vadd.f32 %v613_v21, %v612_v9  ;;  %v2142_v15 = vld [vmem:[%s1913_s26 + $0x58] sm:$0xff]  ;;  %v2158_v21 = vld [vmem:[%s1904_s17 + $0x90] sm:$0xff] }
  0xaf   : > { %3144 = vst [vmem:[#allocation37_spill] sm:$0xff] %v2123_v35  ;;  %3145 = vst [vmem:[#allocation38_spill] sm:$0xff] %v2125_v0  ;;  %v636_v12 = vadd.f32 %v635_v10, %v634_v8  ;;  %v844_v58 = vadd.f32 %v843_v3, %v842_v28  ;;  %v660_v62 = vadd.f32 %v659_v31, %v658_v20  ;;  %v648_v9 = vsel %vm605_vm0, %v587_v33, 0.0  ;;  %v2161_v8 = vld [vmem:[%s1913_s26 + $0x90] sm:$0xff] }
  0xb0   : > { %v626_v52 = vrot.slane %v625_v40, 4  ;;  %v834_v41 = vrot.slane %v833_v11, 4  ;;  %v868_v1 = vadd.f32 %v867_v32, %v866_v29  ;;  %v2151_v43 = vadd.f32 %v821_v25, %v820_v24  ;;  %3152 = vst [vmem:[#allocation45_spill] sm:$0xff] %v2158_v21  ;;  %3153 = vst [vmem:[#allocation46_spill] sm:$0xff] %v2161_v8 }
  0xb1   : > { %v856_v49 = vsel %vm605_vm0, %v796_v2, 0.0  ;;  %v594_v17 = vmul.f32 %v2123_v35, %v2130_v51  ;;  %v803_v29 = vmul.f32 %v2123_v35, %v2133_v45  ;;  %v593_v20 = vmul.f32 %v2125_v0, %v2136_v30  ;;  %v2191_v30 = vld [vmem:[%s1913_s26 + $0xc8] sm:$0xff] }
  0xb2   : > { %v2147_v16 = vpop.permute.xlu1 %460  ;;  %v2149_v42 = vpop.permute.xlu0 %426  ;;  %v615_v10 = vrot.slane %v614_v19, 2  ;;  %v2171_v22 = vadd.f32 %v626_v52, %v625_v40  ;;  %v2173_v31 = vadd.f32 %v834_v41, %v833_v11  ;;  %v802_v32 = vmul.f32 %v2125_v0, %v2145_v14  ;;  %v2188_v14 = vld [vmem:[%s1904_s17 + $0xc8] sm:$0xff]  ;;  %3157 = vst [vmem:[#allocation50_spill] sm:$0xff] %v2191_v30 }
  0xb3   : > { %3150 = vst [vmem:[#allocation43_spill] sm:$0xff] %v2147_v16  ;;  %3151 = vst [vmem:[#allocation44_spill] sm:$0xff] %v2149_v42  ;;  %v584_v3 = vmul.f32 %v2149_v42, %v2139_v39  ;;  %v793_v24 = vmul.f32 %v2149_v42, %v2142_v15  ;;  %v591_v33 = vmul.f32 %v2147_v16, %v2158_v21  ;;  %v880_v5 = vsel %vm605_vm0, %v803_v29, 0.0 }
  0xb4   : > { %v800_v25 = vmul.f32 %v2147_v16, %v2161_v8  ;;  %v649_v41 = vadd.f32 %v648_v9, %v647_v13  ;;  %v857_v52 = vadd.f32 %v856_v49, %v855_v44  ;;  %3156 = vst [vmem:[#allocation49_spill] sm:$0xff] %v2188_v14  ;;  %v2194_v16 = vld [vmem:[%s1904_s17 + $0xc0] sm:$0xff]  ;;  %v671_v13 = vsel %vm605_vm0, %v593_v20, 0.0  ;;  %v2204_v44 = vld [vmem:[%s1904_s17 + $0xb0] sm:$0xff] }
  0xb5   : > { %v637_v2 = vsel %vm605_vm0, %v584_v3, 0.0  ;;  %v845_v28 = vsel %vm605_vm0, %v793_v24, 0.0  ;;  %3158 = vst [vmem:[#allocation51_spill] sm:$0xff] %v2194_v16  ;;  %v672_v24 = vsel %vm605_vm0, %v594_v17, 0.0  ;;  %v2201_v9 = vld [vmem:[%s1913_s26 + $0xc0] sm:$0xff]  ;;  %3160 = vst [vmem:[#allocation53_spill] sm:$0xff] %v2204_v44  ;;  %v2218_v17 = vadd.f32 %v615_v10, %v614_v19 }
  0xb6   : > { %v2183_v35 = vpop.permute.xlu1 %494  ;;  %v2185_v40 = vpop.permute.xlu0 %490  ;;  %v638_v11 = vadd.f32 %v637_v2, %v636_v12  ;;  %v846_v0 = vadd.f32 %v845_v28, %v844_v58  ;;  %3159 = vst [vmem:[#allocation52_spill] sm:$0xff] %v2201_v9  ;;  %v628_v12 = vrot.slane %v2171_v22, 2  ;;  %v836_v58 = vrot.slane %v2173_v31, 2  ;;  %v2210_v2 = vld [vmem:[%s1913_s26 + $0xb0] sm:$0xff]  ;;  %v2213_v28 = vld [vmem:[%s1904_s17 + $0x78] sm:$0xff] }
  0xb7   : > { %3154 = vst [vmem:[#allocation47_spill] sm:$0xff] %v2183_v35  ;;  %3155 = vst [vmem:[#allocation48_spill] sm:$0xff] %v2185_v40  ;;  %v879_v49 = vsel %vm605_vm0, %v802_v32, 0.0  ;;  %v2216_v3 = vld [vmem:[%s1913_s26 + $0x78] sm:$0xff]  ;;  %v661_v29 = vsel %vm605_vm0, %v591_v33, 0.0  ;;  %v869_v20 = vsel %vm605_vm0, %v800_v25, 0.0  ;;  %v598_v42 = vmul.f32 %v2183_v35, %v2188_v14 }
  0xb8   : > { %3161 = vst [vmem:[#allocation54_spill] sm:$0xff] %v2210_v2  ;;  %3162 = vst [vmem:[#allocation55_spill] sm:$0xff] %v2213_v28  ;;  %v807_v45 = vmul.f32 %v2183_v35, %v2191_v30  ;;  %v639_v50 = vrot.slane %v638_v11, 4  ;;  %v847_v48 = vrot.slane %v846_v0, 4  ;;  %v597_v19 = vmul.f32 %v2185_v40, %v2194_v16 }
  0xb9   : > { %3163 = vst [vmem:[#allocation56_spill] sm:$0xff] %v2216_v3  ;;  %v806_v10 = vmul.f32 %v2185_v40, %v2201_v9  ;;  %v673_v14 = vadd.f32 %v672_v24, %v671_v13  ;;  %v881_v8 = vadd.f32 %v880_v5, %v879_v49  ;;  %v662_v16 = vadd.f32 %v661_v29, %v660_v62  ;;  %v2271_v49 = vld [vmem:[%s1904_s17 + $0xd0] sm:$0xff] }
  0xba   : > { %v2226_v51 = vpop.permute.xlu1 %479  ;;  %v2228_v32 = vpop.permute.xlu0 %445  ;;  %v870_v21 = vadd.f32 %v869_v20, %v868_v1  ;;  %v685_v40 = vsel %vm605_vm0, %v598_v42, 0.0  ;;  %v893_v9 = vsel %vm605_vm0, %v807_v45, 0.0  ;;  %v2256_v5 = vadd.f32 %v639_v50, %v638_v11  ;;  %v2266_v1 = vld [vmem:[%s1913_s26 + $0xe0] sm:$0xff]  ;;  %3172 = vst [vmem:[#allocation65_spill] sm:$0xff] %v2271_v49 }
  0xbb   : > { %3164 = vst [vmem:[#allocation57_spill] sm:$0xff] %v2226_v51  ;;  %3165 = vst [vmem:[#allocation58_spill] sm:$0xff] %v2228_v32  ;;  %v595_v33 = vmul.f32 %v2226_v51, %v2204_v44  ;;  %v804_v25 = vmul.f32 %v2226_v51, %v2210_v2  ;;  %v588_v35 = vmul.f32 %v2228_v32, %v2213_v28  ;;  %v2247_v2 = vld [vmem:[%s1904_s17 + $0xe8] sm:$0xff]  ;;  %v684_v45 = vsel %vm605_vm0, %v597_v19, 0.0  ;;  %v2284_v19 = vld [vmem:[%s1913_s26 + $0xd0] sm:$0xff] }
  0xbc   : > { %v797_v30 = vmul.f32 %v2228_v32, %v2216_v3  ;;  %3166 = vst [vmem:[#allocation59_spill] sm:$0xff] %v2247_v2  ;;  %v2258_v62 = vadd.f32 %v847_v48, %v846_v0  ;;  %3171 = vst [vmem:[#allocation64_spill] sm:$0xff] %v2266_v1  ;;  %v2274_v50 = vadd.f32 %v628_v12, %v2171_v22 }
  0xbd   : > { %v650_v44 = vsel %vm605_vm0, %v588_v35, 0.0  ;;  %v892_v35 = vsel %vm605_vm0, %v806_v10, 0.0  ;;  %v674_v42 = vsel %vm605_vm0, %v595_v33, 0.0  ;;  %v882_v13 = vsel %vm605_vm0, %v804_v25, 0.0  ;;  %3173 = vst [vmem:[#allocation66_spill] sm:$0xff] %v2284_v19  ;;  %v2287_v10 = vld [vmem:[%s1904_s17 + $0x98] sm:$0xff] }
  0xbe   : > { %v858_v51 = vsel %vm605_vm0, %v797_v30, 0.0  ;;  %v2252_v32 = vpop.permute.xlu1 %513  ;;  %v2254_v24 = vpop.permute.xlu0 %509  ;;  %v2263_v30 = vld [vmem:[%s1904_s17 + $0xe0] sm:$0xff]  ;;  %v2277_v48 = vadd.f32 %v836_v58, %v2173_v31  ;;  %v651_v0 = vadd.f32 %v650_v44, %v649_v41  ;;  %3174 = vst [vmem:[#allocation67_spill] sm:$0xff] %v2287_v10  ;;  %v2290_v33 = vld [vmem:[%s1913_s26 + $0x98] sm:$0xff]  ;;  %v686_v22 = vadd.f32 %v685_v40, %v684_v45 }
  0xbf   : > { %3168 = vst [vmem:[#allocation61_spill] sm:$0xff] %v2252_v32  ;;  %3169 = vst [vmem:[#allocation62_spill] sm:$0xff] %v2254_v24  ;;  %v859_v11 = vadd.f32 %v858_v51, %v857_v52  ;;  %v602_v29 = vmul.f32 %v2252_v32, %v2247_v2  ;;  %v811_v20 = vmul.f32 %v2252_v32, %v2250_v26 }
  0xc0   : > { %3170 = vst [vmem:[#allocation63_spill] sm:$0xff] %v2263_v30  ;;  %3175 = vst [vmem:[#allocation68_spill] sm:$0xff] %v2290_v33  ;;  %v894_v12 = vadd.f32 %v893_v9, %v892_v35  ;;  %v601_v31 = vmul.f32 %v2254_v24, %v2263_v30  ;;  %v810_v51 = vmul.f32 %v2254_v24, %v2266_v1  ;;  %v2311_v24 = vld [vmem:[%s1904_s17 + $0xf0] sm:$0xff]  ;;  %v652_v44 = vrot.slane %v651_v0, 4 }
  0xc1   : > { %v675_v25 = vadd.f32 %v674_v42, %v673_v14  ;;  %v883_v32 = vadd.f32 %v882_v13, %v881_v8  ;;  %3178 = vst [vmem:[#allocation71_spill] sm:$0xff] %v2311_v24  ;;  %v2314_v1 = vld [vmem:[%s1913_s26 + $0xf0] sm:$0xff]  ;;  %v860_v58 = vrot.slane %v859_v11, 4  ;;  %v698_v14 = vsel %vm605_vm0, %v602_v29, 0.0  ;;  %v2319_v42 = vld [vmem:[%s1904_s17 + $0xb8] sm:$0xff] }
  0xc2   : > { %v2296_v41 = vpop.permute.xlu1 %498  ;;  %v2298_v52 = vpop.permute.xlu0 %464  ;;  %3179 = vst [vmem:[#allocation72_spill] sm:$0xff] %v2314_v1  ;;  %v906_v8 = vsel %vm605_vm0, %v811_v20, 0.0  ;;  %3180 = vst [vmem:[#allocation73_spill] sm:$0xff] %v2319_v42  ;;  %v2322_v13 = vld [vmem:[%s1913_s26 + $0xb8] sm:$0xff]  ;;  %v905_v30 = vsel %vm605_vm0, %v810_v51, 0.0 }
  0xc3   : > { %3176 = vst [vmem:[#allocation69_spill] sm:$0xff] %v2296_v41  ;;  %3177 = vst [vmem:[#allocation70_spill] sm:$0xff] %v2298_v52  ;;  %v599_v40 = vmul.f32 %v2296_v41, %v2271_v49  ;;  %v808_v9 = vmul.f32 %v2296_v41, %v2284_v19  ;;  %v592_v45 = vmul.f32 %v2298_v52, %v2287_v10  ;;  %v697_v41 = vsel %vm605_vm0, %v601_v31, 0.0 }
  0xc4   : > { %v801_v35 = vmul.f32 %v2298_v52, %v2290_v33  ;;  %3181 = vst [vmem:[#allocation74_spill] sm:$0xff] %v2322_v13  ;;  %v653_v10 = vadd.f32 %v652_v44, %v651_v0  ;;  %v699_v3 = vadd.f32 %v698_v14, %v697_v41 }
  0xc5   : > { %v663_v26 = vsel %vm605_vm0, %v592_v45, 0.0  ;;  %v687_v29 = vsel %vm605_vm0, %v599_v40, 0.0  ;;  %v895_v20 = vsel %vm605_vm0, %v808_v9, 0.0  ;;  %v861_v40 = vadd.f32 %v860_v58, %v859_v11 }
  0xc6   : > { %v871_v2 = vsel %vm605_vm0, %v801_v35, 0.0  ;;  %v2328_v19 = vpop.permute.xlu1 %517  ;;  %v2330_v52 = vpop.permute.xlu0 %483  ;;  %v664_v49 = vadd.f32 %v663_v26, %v662_v16  ;;  %v2343_v26 = vld [vmem:[%s1904_s17 + $0xf8] sm:$0xff]  ;;  %v688_v11 = vadd.f32 %v687_v29, %v686_v22  ;;  %v896_v41 = vadd.f32 %v895_v20, %v894_v12 }
  0xc7   : > { %3182 = vst [vmem:[#allocation75_spill] sm:$0xff] %v2328_v19  ;;  %3183 = vst [vmem:[#allocation76_spill] sm:$0xff] %v2330_v52  ;;  %v872_v33 = vadd.f32 %v871_v2, %v870_v21  ;;  %v603_v31 = vmul.f32 %v2328_v19, %v2311_v24  ;;  %v812_v51 = vmul.f32 %v2328_v19, %v2314_v1  ;;  %v2346_v16 = vld [vmem:[%s1913_s26 + $0xf8] sm:$0xff] }
  0xc8   : > { %v596_v45 = vmul.f32 %v2330_v52, %v2319_v42  ;;  %v805_v35 = vmul.f32 %v2330_v52, %v2322_v13  ;;  %v665_v9 = vrot.slane %v664_v49, 4  ;;  %3184 = vst [vmem:[#allocation77_spill] sm:$0xff] %v2343_v26  ;;  %3185 = vst [vmem:[#allocation78_spill] sm:$0xff] %v2346_v16  ;;  %v907_v21 = vadd.f32 %v906_v8, %v905_v30  ;;  %v2354_v42 = vld [vmem:[%s1904_s17 + $0xd8] sm:$0xff]  ;;  %s1722_s17 = scalar_lea.vmem %s1552_s12, 128 }
  0xc9   : > { %v700_v2 = vsel %vm605_vm0, %v603_v31, 0.0  ;;  %3187 = vst [vmem:[#allocation80_spill] sm:$0xff] %v2354_v42  ;;  %v2357_v52 = vld [vmem:[%s1913_s26 + $0xd8] sm:$0xff]  ;;  %v873_v44 = vrot.slane %v872_v33, 4  ;;  %v908_v58 = vsel %vm605_vm0, %v812_v51, 0.0  ;;  %p1723_p12 = scmp.ne.s32.totalorder %s1552_s12, %s1722_s17  ;;  %p1730_p2 = scmp.lt.s32.totalorder %s1728_s25, %s1722_s17 }
  0xca   : > { %v676_v24 = vsel %vm605_vm0, %v596_v45, 0.0  ;;  %v884_v19 = vsel %vm605_vm0, %v805_v35, 0.0  ;;  %v2351_v1 = vpop.permute.xlu1 %521  ;;  %3188 = vst [vmem:[#allocation81_spill] sm:$0xff] %v2357_v52  ;;  %v2359_v0 = vpop.permute.xlu0 %502  ;;  %v666_v45 = vadd.f32 %v665_v9, %v664_v49  ;;  %v701_v35 = vadd.f32 %v700_v2, %v699_v3 }
  0xcb   : > { %3186 = vst [vmem:[#allocation79_spill] sm:$0xff] %v2351_v1  ;;  %3189 = vst [vmem:[#allocation82_spill] sm:$0xff] %v2359_v0  ;;  %v677_v30 = vadd.f32 %v676_v24, %v675_v25  ;;  %v885_v14 = vadd.f32 %v884_v19, %v883_v32  ;;  %v604_v8 = vmul.f32 %v2351_v1, %v2343_v26  ;;  %p1724_p13 = pnand %p1723_p12, %p1855_p5  ;;  %p1731_p3 = por %p1730_p2, %p1729_p1 }
  0xcc   : > { %v813_v31 = vmul.f32 %v2351_v1, %v2346_v16  ;;  %v600_v13 = vmul.f32 %v2359_v0, %v2354_v42  ;;  %v809_v22 = vmul.f32 %v2359_v0, %v2357_v52  ;;  %v874_v24 = vadd.f32 %v873_v44, %v872_v33 }
  0xcd   : > { %v678_v12 = vrot.slane %v677_v30, 4  ;;  %v886_v29 = vrot.slane %v885_v14, 4  ;;  %v702_v20 = vsel %vm605_vm0, %v604_v8, 0.0  ;;  %v909_v19 = vadd.f32 %v908_v58, %v907_v21  ;;  %p1725_p0 = pneg %p1724_p13 }
  0xce   : > { %v910_v32 = vsel %vm605_vm0, %v813_v31, 0.0  ;;  %v689_v25 = vsel %vm605_vm0, %v600_v13, 0.0  ;;  %v897_v51 = vsel %vm605_vm0, %v809_v22, 0.0  ;;  %v703_v9 = vadd.f32 %v702_v20, %v701_v35 }
  0xcf   : > { %v679_v49 = vadd.f32 %v678_v12, %v677_v30  ;;  %v887_v3 = vadd.f32 %v886_v29, %v885_v14  ;;  %v690_v2 = vadd.f32 %v689_v25, %v688_v11  ;;  %v911_v1 = vadd.f32 %v910_v32, %v909_v19  ;;  %p1732_p4 = pnand %p1731_p3, %p1725_p0 }
  0xd0   : > { %v630_v16 = vrot.slane %v2274_v50, 1  ;;  %v838_v0 = vrot.slane %v2277_v48, 1  ;;  %v3190_v8 = vrot.slane %v2151_v43, 2  ;;  %v654_v31 = vrot.slane %v653_v10, 2 }
  0xd1   : > { %v862_v33 = vrot.slane %v861_v40, 2  ;;  %v667_v21 = vrot.slane %v666_v45, 2  ;;  %v898_v44 = vadd.f32 %v897_v51, %v896_v41  ;;  %v875_v13 = vrot.slane %v874_v24, 2 }
  0xd2   : > { %v824_v26 = vadd.f32 %v3190_v8, %v2151_v43  ;;  %v680_v58 = vrot.slane %v679_v49, 2  ;;  %v3191_v30 = vrot.slane %v2256_v5, 2  ;;  %v3192_v11 = vrot.slane %v2258_v62, 2 }
  0xd3   : > { %v888_v22 = vrot.slane %v887_v3, 2  ;;  %v704_v12 = vrot.slane %v703_v9, 4  ;;  %v691_v29 = vrot.slane %v690_v2, 4  ;;  %v617_v20 = vrot.slane %v2218_v17, 1 }
  0xd4   : > { %v642_v14 = vadd.f32 %v3191_v30, %v2256_v5  ;;  %v850_v35 = vadd.f32 %v3192_v11, %v2258_v62  ;;  %v912_v43 = vrot.slane %v911_v1, 4  ;;  %v631_v32 = vadd.f32 %v630_v16, %v2274_v50 }
  0xd5   : > { %v839_v41 = vadd.f32 %v838_v0, %v2277_v48  ;;  %v825_v19 = vrot.slane %v824_v26, 1  ;;  %v899_v25 = vrot.slane %v898_v44, 4  ;;  %v655_v51 = vadd.f32 %v654_v31, %v653_v10 }
  0xd6   : > { %v863_v8 = vadd.f32 %v862_v33, %v861_v40  ;;  %v668_v52 = vadd.f32 %v667_v21, %v666_v45  ;;  %v643_v42 = vrot.slane %v642_v14, 1  ;;  %v851_v34 = vrot.slane %v850_v35, 1 }
  0xd7   : > { %v720_v5 = vpop.permute.xlu1 %719  ;;  %v712_v30 = vpop.permute.xlu0 %711  ;;  %v876_v62 = vadd.f32 %v875_v13, %v874_v24  ;;  %v681_v11 = vadd.f32 %v680_v58, %v679_v49  ;;  %v2388_v28 = vadd.f32 %v704_v12, %v703_v9  ;;  %v692_v27 = vadd.f32 %v691_v29, %v690_v2 }
  0xd8   : > { %v2391_v7 = vrot.slane %v720_v5, %v1874_v4  ;;  %v889_v50 = vadd.f32 %v888_v22, %v887_v3  ;;  %v2393_v16 = vadd.f32 %v912_v43, %v911_v1  ;;  %v618_v48 = vadd.f32 %v617_v20, %v2218_v17 }
  0xd9   : > { %v826_v10 = vadd.f32 %v825_v19, %v824_v26  ;;  %v2397_v40 = vrot.slane %v712_v30, %v1874_v4  ;;  %v900_v0 = vadd.f32 %v899_v25, %v898_v44  ;;  %v656_v45 = vrot.slane %v655_v51, 1 }
  0xda   : > { %v864_v31 = vrot.slane %v863_v8, 1  ;;  %v669_v24 = vrot.slane %v668_v52, 1  ;;  %v644_v9 = vadd.f32 %v643_v42, %v642_v14  ;;  %v852_v33 = vadd.f32 %v851_v34, %v850_v35 }
  0xdb   : > { %v728_v49 = vpop.permute.xlu1 %727  ;;  %v736_v2 = vpop.permute.xlu0 %735  ;;  %v877_v21 = vrot.slane %v876_v62, 1  ;;  %v682_v13 = vrot.slane %v681_v11, 1  ;;  %v706_v3 = vrot.slane %v2388_v28, 2  ;;  %v693_v1 = vrot.slane %v692_v27, 2 }
  0xdc   : > { %v2401_v58 = vadd.f32 %v2391_v7, %v631_v32  ;;  %v890_v17 = vrot.slane %v889_v50, 1  ;;  %v914_v26 = vrot.slane %v2393_v16, 2  ;;  %v2405_v44 = vadd.f32 %v839_v41, %v2391_v7 }
  0xdd   : > { %v2408_v22 = vadd.f32 %v2397_v40, %v618_v48  ;;  %v2411_v34 = vadd.f32 %v826_v10, %v2397_v40  ;;  %v901_v42 = vrot.slane %v900_v0, 2  ;;  %v657_v14 = vadd.f32 %v656_v45, %v655_v51 }
  0xde   : > { %v865_v35 = vadd.f32 %v864_v31, %v863_v8  ;;  %v670_v12 = vadd.f32 %v669_v24, %v668_v52  ;;  %v2414_v29 = vrot.slane %v728_v49, %v1874_v4  ;;  %v2417_v20 = vrot.slane %v736_v2, %v1874_v4 }
  0xdf   : > { %v878_v43 = vadd.f32 %v877_v21, %v876_v62  ;;  %v683_v32 = vadd.f32 %v682_v13, %v681_v11  ;;  %v932_v41 = vmul.f32 %v2401_v58, %v1954_v59  ;;  %v933_v19 = vmul.f32 %v2401_v58, %v2080_v36  ;;  %v744_v25 = vpop.permute.xlu1 %743  ;;  %v752_v11 = vpop.permute.xlu0 %751 }
  0xe0   : > { %v891_v5 = vadd.f32 %v890_v17, %v889_v50  ;;  %v694_v30 = vadd.f32 %v693_v1, %v692_v27  ;;  %v964_v52 = vmul.f32 %v2405_v44, %v1957_v60  ;;  %v965_v51 = vmul.f32 %v2405_v44, %v2083_v37  ;;  %v3197_v1 = vld [vmem:[#allocation55_spill] sm:$0xff]  ;;  %v3198_v17 = vld [vmem:[#allocation26_spill] sm:$0xff] }
  0xe1   : > { %v928_v8 = vmul.f32 %v2408_v22, %v1960_v61  ;;  %v960_v62 = vmul.f32 %v2411_v34, %v1965_v63  ;;  %v929_v59 = vmul.f32 %v2408_v22, %v2029_v56  ;;  %v2434_v36 = vadd.f32 %v2414_v29, %v644_v9 }
  0xe2   : > { %v2437_v27 = vadd.f32 %v852_v33, %v2414_v29  ;;  %v2439_v60 = vadd.f32 %v901_v42, %v900_v0  ;;  %v961_v37 = vmul.f32 %v2411_v34, %v2032_v57  ;;  %v2444_v61 = vadd.f32 %v2417_v20, %v657_v14 }
  0xe3   : > { %v2447_v63 = vadd.f32 %v865_v35, %v2417_v20  ;;  %v2450_v50 = vrot.slane %v744_v25, %v1874_v4  ;;  %v2454_v56 = vmul.f32 %v2401_v58, %v1922_v46  ;;  %v2458_v48 = vmul.f32 %v2405_v44, %v1925_v47  ;;  %v760_v14 = vpop.permute.xlu1 %759  ;;  %v3201_v25 = vld [vmem:[#allocation33_spill] sm:$0xff] }
  0xe4   : > { %v926_v57 = vmul.f32 %v2408_v22, %v1942_v54  ;;  %v2463_v10 = vrot.slane %v752_v11, %v1874_v4  ;;  %v2465_v0 = vadd.f32 %v964_v52, %v932_v41  ;;  %v2467_v45 = vadd.f32 %v965_v51, %v933_v19  ;;  %v3202_v52 = vld [vmem:[#allocation45_spill] sm:$0xff]  ;;  %v3204_v11 = vld [vmem:[#allocation46_spill] sm:$0xff] }
  0xe5   : > { %3193 = vst [vmem:[#allocation83_spill] sm:$0xff] %v2450_v50  ;;  %v958_v31 = vmul.f32 %v2411_v34, %v1945_v55  ;;  %v2471_v24 = vadd.f32 %v960_v62, %v928_v8  ;;  %v936_v46 = vmul.f32 %v2434_v36, %v2050_v18  ;;  %v937_v47 = vmul.f32 %v2434_v36, %v2139_v39  ;;  %v3203_v8 = vld [vmem:[#allocation67_spill] sm:$0xff] }
  0xe6   : > { %3194 = vst [vmem:[#allocation84_spill] sm:$0xff] %v2463_v10  ;;  %v968_v54 = vmul.f32 %v2437_v27, %v2059_v23  ;;  %v969_v49 = vmul.f32 %v2437_v27, %v2142_v15  ;;  %v2481_v9 = vadd.f32 %v961_v37, %v929_v59  ;;  %v940_v33 = vmul.f32 %v2444_v61, %v2102_v53  ;;  %v3195_v53 = vld [vmem:[#allocation18_spill] sm:$0xff] }
  0xe7   : > { %v972_v55 = vmul.f32 %v2447_v63, %v2113_v38  ;;  %v2488_v2 = vadd.f32 %v2450_v50, %v670_v12  ;;  %v2492_v39 = vmul.f32 %v2434_v36, %v1973_v6  ;;  %v2495_v18 = vadd.f32 %v878_v43, %v2450_v50  ;;  %v3196_v38 = vld [vmem:[#allocation23_spill] sm:$0xff]  ;;  %v3200_v43 = vld [vmem:[#allocation56_spill] sm:$0xff]  ;;  %v3239_v50 = vld [vmem:[#allocation58_spill] sm:$0xff] }
  0xe8   : > { %v2498_v23 = vadd.f32 %v2463_v10, %v683_v32  ;;  %v2501_v15 = vadd.f32 %v891_v5, %v2463_v10  ;;  %v2505_v21 = vmul.f32 %v2437_v27, %v3195_v53  ;;  %v2509_v13 = vmul.f32 %v2444_v61, %v3196_v38  ;;  %v3209_v38 = vld [vmem:[#allocation15_spill] sm:$0xff] }
  0xe9   : > { %v941_v6 = vmul.f32 %v2444_v61, %v3197_v1  ;;  %v2515_v42 = vmul.f32 %v2447_v63, %v3198_v17  ;;  %v2517_v35 = vadd.f32 %v968_v54, %v936_v46  ;;  %v2519_v12 = vadd.f32 %v969_v49, %v937_v47  ;;  %v3206_v47 = vld [vmem:[#allocation14_spill] sm:$0xff]  ;;  %v3207_v49 = vld [vmem:[#allocation68_spill] sm:$0xff] }
  0xea   : > { %v973_v32 = vmul.f32 %v2447_v63, %v3200_v43  ;;  %v695_v41 = vrot.slane %v694_v30, 1  ;;  %v2523_v19 = vadd.f32 %v972_v55, %v940_v33  ;;  %v2527_v5 = vmul.f32 %v2488_v2, %v3201_v25  ;;  %v3208_v55 = vld [vmem:[#allocation53_spill] sm:$0xff] }
  0xeb   : > { %3199 = vst [vmem:[#allocation18_spill] sm:$0xff] %v2519_v12  ;;  %v944_v51 = vmul.f32 %v2488_v2, %v3202_v52  ;;  %v945_v62 = vmul.f32 %v2488_v2, %v3203_v8  ;;  %v976_v59 = vmul.f32 %v2495_v18, %v3204_v11  ;;  %v2536_v37 = vrot.slane %v760_v14, %v1874_v4  ;;  %v3210_v14 = vld [vmem:[#allocation54_spill] sm:$0xff] }
  0xec   : > { %v707_v46 = vadd.f32 %v706_v3, %v2388_v28  ;;  %v927_v54 = vmul.f32 %v2408_v22, %v3206_v47  ;;  %v977_v33 = vmul.f32 %v2495_v18, %v3207_v49  ;;  %v948_v53 = vmul.f32 %v2498_v23, %v3208_v55  ;;  %v3211_v22 = vld [vmem:[#allocation73_spill] sm:$0xff]  ;;  %v3212_v8 = vld [vmem:[#allocation74_spill] sm:$0xff] }
  0xed   : > { %3205 = vst [vmem:[#allocation23_spill] sm:$0xff] %v2536_v37  ;;  %v959_v1 = vmul.f32 %v2411_v34, %v3209_v38  ;;  %v2549_v17 = vadd.f32 %v958_v31, %v926_v57  ;;  %v980_v43 = vmul.f32 %v2501_v15, %v3210_v14  ;;  %v696_v25 = vadd.f32 %v695_v41, %v694_v30  ;;  %v3213_v34 = vld [vmem:[#allocation7_spill] sm:$0xff]  ;;  %v3214_v30 = vld [vmem:[#allocation34_spill] sm:$0xff]  ;;  %v3216_v14 = vld [vmem:[#allocation40_spill] sm:$0xff] }
  0xee   : > { %v903_v28 = vrot.slane %v2439_v60, 1  ;;  %v915_v3 = vadd.f32 %v914_v26, %v2393_v16  ;;  %v949_v52 = vmul.f32 %v2498_v23, %v3211_v22  ;;  %v981_v11 = vmul.f32 %v2501_v15, %v3212_v8  ;;  %v768_v26 = vpop.permute.xlu0 %767  ;;  %v3217_v8 = vld [vmem:[#allocation9_spill] sm:$0xff] }
  0xef   : > { %v2561_v47 = vadd.f32 %v959_v1, %v927_v54  ;;  %v1022_v57 = vmul.f32 %v2549_v17, %v3213_v34  ;;  %v2565_v31 = vadd.f32 %v973_v32, %v941_v6  ;;  %v2569_v41 = vmul.f32 %v2495_v18, %v3214_v30  ;;  %v3215_v54 = vld [vmem:[#allocation39_spill] sm:$0xff] }
  0xf0   : > { %v2572_v49 = vadd.f32 %v2536_v37, %v696_v25  ;;  %v708_v16 = vrot.slane %v707_v46, 1  ;;  %v2574_v55 = vadd.f32 %v976_v59, %v944_v51  ;;  %v2576_v38 = vadd.f32 %v977_v33, %v945_v62  ;;  %v3218_v59 = vld [vmem:[#allocation17_spill] sm:$0xff] }
  0xf1   : > { %v2580_v1 = vmul.f32 %v2498_v23, %v3215_v54  ;;  %v2584_v6 = vmul.f32 %v2501_v15, %v3216_v14  ;;  %v2586_v32 = vadd.f32 %v980_v43, %v948_v53  ;;  %v904_v22 = vadd.f32 %v903_v28, %v2439_v60  ;;  %v3219_v53 = vld [vmem:[#allocation49_spill] sm:$0xff]  ;;  %v3220_v28 = vld [vmem:[#allocation31_spill] sm:$0xff]  ;;  %v3222_v14 = vld [vmem:[#allocation12_spill] sm:$0xff] }
  0xf2   : > { %v916_v25 = vrot.slane %v915_v3, 1  ;;  %v1023_v34 = vmul.f32 %v2561_v47, %v3217_v8  ;;  %v2591_v51 = vadd.f32 %v981_v11, %v949_v52  ;;  %v2594_v62 = vrot.slane %v768_v26, %v1874_v4  ;;  %v3221_v11 = vld [vmem:[#allocation65_spill] sm:$0xff] }
  0xf3   : > { %v1024_v33 = vmul.f32 %v2471_v24, %v3218_v59  ;;  %v1054_v30 = vsel %vm605_vm0, %v1022_v57, 0.0  ;;  %v2600_v54 = vadd.f32 %v904_v22, %v2536_v37  ;;  %v2604_v60 = vmul.f32 %v2572_v49, %v3219_v53  ;;  %v3223_v22 = vld [vmem:[#allocation13_spill] sm:$0xff]  ;;  %v3224_v59 = vld [vmem:[#allocation80_spill] sm:$0xff] }
  0xf4   : > { %v2606_v43 = vadd.f32 %v708_v16, %v707_v46  ;;  %v1025_v52 = vmul.f32 %v2481_v9, %v3220_v28  ;;  %v2612_v4 = vmul.f32 %v2572_v49, %v3221_v11  ;;  %v1055_v26 = vsel %vm605_vm0, %v1023_v34, 0.0  ;;  %v3225_v37 = vld [vmem:[#allocation16_spill] sm:$0xff] }
  0xf5   : > { %v930_v57 = vmul.f32 %v2401_v58, %v3222_v14  ;;  %v962_v8 = vmul.f32 %v2405_v44, %v3223_v22  ;;  %v2621_v53 = vmul.f32 %v2572_v49, %v3224_v59  ;;  %v2623_v46 = vadd.f32 %v916_v25, %v915_v3  ;;  %v3226_v14 = vld [vmem:[#allocation19_spill] sm:$0xff]  ;;  %v3227_v59 = vld [vmem:[#allocation8_spill] sm:$0xff]  ;;  %v3228_v25 = vld [vmem:[#allocation22_spill] sm:$0xff] }
  0xf6   : > { %v1056_v16 = vadd.f32 %v1055_v26, %v1054_v30  ;;  %v2627_v28 = vadd.f32 %v2458_v48, %v2454_v56  ;;  %v1057_v11 = vsel %vm605_vm0, %v1024_v33, 0.0  ;;  %v1028_v58 = vmul.f32 %v2465_v0, %v3225_v37  ;;  %v3229_v33 = vld [vmem:[#allocation6_spill] sm:$0xff]  ;;  %v3230_v37 = vld [vmem:[#allocation36_spill] sm:$0xff] }
  0xf7   : > { %v2630_v34 = vadd.f32 %v962_v8, %v930_v57  ;;  %v934_v44 = vmul.f32 %v2434_v36, %v3226_v14  ;;  %v966_v30 = vmul.f32 %v2437_v27, %v3228_v25  ;;  %v2642_v56 = vadd.f32 %v2505_v21, %v2492_v39  ;;  %v3231_v36 = vld [vmem:[#allocation25_spill] sm:$0xff]  ;;  %v3232_v27 = vld [vmem:[#allocation10_spill] sm:$0xff] }
  0xf8   : > { %v1058_v22 = vadd.f32 %v1057_v11, %v1056_v16  ;;  %v1027_v3 = vmul.f32 %v2627_v28, %v3227_v59  ;;  %v1059_v48 = vsel %vm605_vm0, %v1025_v52, 0.0  ;;  %v1029_v57 = vmul.f32 %v2467_v45, %v3230_v37  ;;  %v3233_v59 = vld [vmem:[#allocation44_spill] sm:$0xff] }
  0xf9   : > { %v1026_v26 = vmul.f32 %v2630_v34, %v3229_v33  ;;  %v1032_v8 = vmul.f32 %v2517_v35, %v3231_v36  ;;  %v2652_v14 = vadd.f32 %v966_v30, %v934_v44  ;;  %v1031_v39 = vmul.f32 %v2642_v56, %v3232_v27  ;;  %v3234_v33 = vld [vmem:[#allocation27_spill] sm:$0xff] }
  0xfa   : > { %v1060_v16 = vadd.f32 %v1059_v48, %v1058_v22  ;;  %v1068_v11 = vsel %vm605_vm0, %v1027_v3, 0.0  ;;  %v1070_v52 = vsel %vm605_vm0, %v1028_v58, 0.0  ;;  %v1033_v25 = vmul.f32 %v2519_v12, %v3233_v59  ;;  %v3235_v22 = vld [vmem:[#allocation11_spill] sm:$0xff] }
  0xfb   : > { %v1067_v21 = vsel %vm605_vm0, %v1026_v26, 0.0  ;;  %v938_v37 = vmul.f32 %v2444_v61, %v3234_v33  ;;  %v1030_v3 = vmul.f32 %v2652_v14, %v3235_v22  ;;  %v1081_v44 = vsel %vm605_vm0, %v1031_v39, 0.0  ;;  %v3236_v26 = vld [vmem:[#allocation28_spill] sm:$0xff] }
  0xfc   : > { %v1061_v10 = vrot.slane %v1060_v16, 4  ;;  %v1069_v36 = vadd.f32 %v1068_v11, %v1067_v21  ;;  %v1072_v30 = vsel %vm605_vm0, %v1029_v57, 0.0  ;;  %v1083_v48 = vsel %vm605_vm0, %v1032_v8, 0.0  ;;  %v3237_v21 = vld [vmem:[#allocation35_spill] sm:$0xff]  ;;  %v3238_v57 = vld [vmem:[#allocation20_spill] sm:$0xff] }
  0xfd   : > { %v970_v58 = vmul.f32 %v2447_v63, %v3236_v26  ;;  %v2671_v27 = vadd.f32 %v2515_v42, %v2509_v13  ;;  %v1080_v11 = vsel %vm605_vm0, %v1030_v3, 0.0  ;;  %v1036_v33 = vmul.f32 %v2523_v19, %v3237_v21  ;;  %v3242_v3 = vld [vmem:[#allocation30_spill] sm:$0xff] }
  0xfe   : > { %v1062_v59 = vadd.f32 %v1061_v10, %v1060_v16  ;;  %v1071_v61 = vadd.f32 %v1070_v52, %v1069_v36  ;;  %v1082_v22 = vadd.f32 %v1081_v44, %v1080_v11  ;;  %v1037_v63 = vmul.f32 %v2565_v31, %v3239_v50  ;;  %v3240_v10 = vld [vmem:[#allocation29_spill] sm:$0xff] }
  0xff   : > { %v2676_v39 = vadd.f32 %v970_v58, %v938_v37  ;;  %v1035_v8 = vmul.f32 %v2671_v27, %v3238_v57  ;;  %v1085_v13 = vsel %vm605_vm0, %v1033_v25, 0.0  ;;  %v942_v42 = vmul.f32 %v2488_v2, %v3240_v10  ;;  %v3241_v52 = vld [vmem:[#allocation21_spill] sm:$0xff]  ;;  %v3245_v10 = vld [vmem:[#allocation43_spill] sm:$0xff] }
 0x100   : > { %v1063_v26 = vrot.slane %v1062_v59, 2  ;;  %v1073_v12 = vadd.f32 %v1072_v30, %v1071_v61  ;;  %v1084_v16 = vadd.f32 %v1083_v48, %v1082_v22  ;;  %v974_v44 = vmul.f32 %v2495_v18, %v3242_v3 }
 0x101   : > { %v1034_v36 = vmul.f32 %v2676_v39, %v3241_v52  ;;  %v1094_v37 = vsel %vm605_vm0, %v1035_v8, 0.0  ;;  %v1096_v50 = vsel %vm605_vm0, %v1036_v33, 0.0  ;;  %v2693_v30 = vadd.f32 %v2569_v41, %v2527_v5  ;;  %v3243_v8 = vld [vmem:[#allocation32_spill] sm:$0xff]  ;;  %v3246_v41 = vld [vmem:[#allocation70_spill] sm:$0xff] }
 0x102   : > { %v1064_v58 = vadd.f32 %v1063_v26, %v1062_v59  ;;  %v1074_v11 = vrot.slane %v1073_v12, 4  ;;  %v1086_v25 = vadd.f32 %v1085_v13, %v1084_v16  ;;  %v1098_v48 = vsel %vm605_vm0, %v1037_v63, 0.0  ;;  %v3244_v26 = vld [vmem:[#allocation24_spill] sm:$0xff] }
 0x103   : > { %v1093_v2 = vsel %vm605_vm0, %v1034_v36, 0.0  ;;  %v2697_v61 = vadd.f32 %v974_v44, %v942_v42  ;;  %v1039_v18 = vmul.f32 %v2693_v30, %v3243_v8  ;;  %v1040_v5 = vmul.f32 %v2574_v55, %v3245_v10  ;;  %v3248_v44 = vld [vmem:[#allocation42_spill] sm:$0xff] }
 0x104   : > { %v1065_v21 = vrot.slane %v1064_v58, 1  ;;  %v1075_v22 = vadd.f32 %v1074_v11, %v1073_v12  ;;  %v1095_v57 = vadd.f32 %v1094_v37, %v1093_v2  ;;  %v1087_v59 = vrot.slane %v1086_v25, 4  ;;  %v3247_v37 = vld [vmem:[#allocation41_spill] sm:$0xff] }
 0x105   : > { %v1038_v33 = vmul.f32 %v2697_v61, %v3244_v26  ;;  %v1041_v13 = vmul.f32 %v2576_v38, %v3246_v41  ;;  %v1107_v52 = vsel %vm605_vm0, %v1039_v18, 0.0  ;;  %v946_v3 = vmul.f32 %v2498_v23, %v3247_v37 }
 0x106   : > { %v1066_v16 = vadd.f32 %v1065_v21, %v1064_v58  ;;  %v1076_v63 = vrot.slane %v1075_v22, 2  ;;  %v1097_v42 = vadd.f32 %v1096_v50, %v1095_v57  ;;  %v1088_v12 = vadd.f32 %v1087_v59, %v1086_v25  ;;  %v3249_v58 = vld [vmem:[#allocation50_spill] sm:$0xff] }
 0x107   : > { %v1106_v36 = vsel %vm605_vm0, %v1038_v33, 0.0  ;;  %v978_v11 = vmul.f32 %v2501_v15, %v3248_v44  ;;  %v2718_v50 = vmul.f32 %v2600_v54, %v3249_v58  ;;  %v3250_v21 = vld [vmem:[#allocation66_spill] sm:$0xff]  ;;  %v1109_v18 = vsel %vm605_vm0, %v1040_v5, 0.0  ;;  %v3253_v58 = vld [vmem:[#allocation37_spill] sm:$0xff] }
 0x108   : > { %v2714_v2 = vadd.f32 %v1066_v16, %v2397_v40  ;;  %v1077_v8 = vadd.f32 %v1076_v63, %v1075_v22  ;;  %v1099_v26 = vadd.f32 %v1098_v48, %v1097_v42  ;;  %v1108_v10 = vadd.f32 %v1107_v52, %v1106_v36 }
 0x109   : > { %v984_v25 = vmul.f32 %v2600_v54, %v3250_v21  ;;  %v1089_v57 = vrot.slane %v1088_v12, 2  ;;  %v1111_v48 = vsel %vm605_vm0, %v1041_v13, 0.0  ;;  %v2728_v41 = vadd.f32 %v978_v11, %v946_v3 }
 0x10a   : > { %v1167_v23 = vmul.f32 %v2714_v2, %v2561_v47  ;;  %v1166_v40 = vmul.f32 %v2714_v2, %v2549_v17  ;;  %v1078_v15 = vrot.slane %v1077_v8, 1  ;;  %v1100_v59 = vrot.slane %v1099_v26, 4  ;;  %v3251_v47 = vld [vmem:[#allocation81_spill] sm:$0xff] }
 0x10b   : > { %v1090_v22 = vadd.f32 %v1089_v57, %v1088_v12  ;;  %v1110_v33 = vadd.f32 %v1109_v18, %v1108_v10  ;;  %v2734_v5 = vadd.f32 %v2584_v6, %v2580_v1  ;;  %v985_v17 = vmul.f32 %v2600_v54, %v3251_v47  ;;  %v3254_v18 = vld [vmem:[#allocation71_spill] sm:$0xff] }
 0x10c   : > { %v1201_v16 = vsel %vm605_vm0, %v1167_v23, 0.0  ;;  %v1198_v63 = vsel %vm605_vm0, %v1166_v40, 0.0  ;;  %v1079_v42 = vadd.f32 %v1078_v15, %v1077_v8  ;;  %v1101_v52 = vadd.f32 %v1100_v59, %v1099_v26  ;;  %v3252_v8 = vld [vmem:[#allocation38_spill] sm:$0xff]  ;;  %v3257_v59 = vld [vmem:[#allocation72_spill] sm:$0xff] }
 0x10d   : > { %1202 = vadd.xlane.f32.xlu0 %v1201_v16  ;;  %1199 = vadd.xlane.f32.xlu1 %v1198_v63  ;;  %v1091_v13 = vrot.slane %v1090_v22, 1  ;;  %v1112_v12 = vadd.f32 %v1111_v48, %v1110_v33  ;;  %v2739_v36 = vadd.f32 %v984_v25, %v2612_v4  ;;  %v2743_v37 = vadd.f32 %v2594_v62, %v2606_v43  ;;  %v3256_v48 = vld [vmem:[#allocation57_spill] sm:$0xff] }
 0x10e   : > { %v2747_v3 = vadd.f32 %v2623_v46, %v2594_v62  ;;  %v1159_v1 = vadd.f32 %v1079_v42, %v2391_v7  ;;  %v1102_v44 = vrot.slane %v1101_v52, 2  ;;  %v1042_v26 = vmul.f32 %v2728_v41, %v3252_v8 }
 0x10f   : > { %v1092_v6 = vadd.f32 %v1091_v13, %v1090_v22  ;;  %v1113_v11 = vrot.slane %v1112_v12, 4  ;;  %v1168_v43 = vmul.f32 %v2714_v2, %v2471_v24  ;;  %v1043_v21 = vmul.f32 %v2734_v5, %v3253_v58  ;;  %v3255_v24 = vld [vmem:[#allocation77_spill] sm:$0xff]  ;;  %v3258_v13 = vld [vmem:[#allocation76_spill] sm:$0xff]  ;;  %v3262_v58 = vld [vmem:[#allocation59_spill] sm:$0xff] }
 0x110   : > { %v1170_v10 = vmul.f32 %v1159_v1, %v2630_v34  ;;  %v1171_v4 = vmul.f32 %v1159_v1, %v2627_v28  ;;  %v2759_v46 = vadd.f32 %v985_v17, %v2621_v53  ;;  %v1103_v25 = vadd.f32 %v1102_v44, %v1101_v52 }
 0x111   : > { %v1160_v7 = vadd.f32 %v1092_v6, %v2414_v29  ;;  %v1114_v57 = vadd.f32 %v1113_v11, %v1112_v12  ;;  %v956_v23 = vmul.f32 %v2743_v37, %v3254_v18  ;;  %v1172_v40 = vmul.f32 %v1159_v1, %v2465_v0  ;;  %v3259_v11 = vld [vmem:[#allocation51_spill] sm:$0xff] }
 0x112   : > { %v1210_v34 = vsel %vm605_vm0, %v1170_v10, 0.0  ;;  %v1213_v28 = vsel %vm605_vm0, %v1171_v4, 0.0  ;;  %v957_v15 = vmul.f32 %v2743_v37, %v3255_v24  ;;  %v1104_v53 = vrot.slane %v1103_v25, 1  ;;  %v3261_v4 = vld [vmem:[#allocation52_spill] sm:$0xff]  ;;  %v3263_v24 = vld [vmem:[#allocation47_spill] sm:$0xff] }
 0x113   : > { %1211 = vadd.xlane.f32.xlu0 %v1210_v34  ;;  %1214 = vadd.xlane.f32.xlu1 %v1213_v28  ;;  %v1044_v29 = vmul.f32 %v2586_v32, %v3256_v48  ;;  %v1119_v22 = vsel %vm605_vm0, %v1042_v26, 0.0  ;;  %v988_v33 = vmul.f32 %v2747_v3, %v3257_v59  ;;  %v1204_v16 = vsel %vm605_vm0, %v1168_v43, 0.0  ;;  %v3260_v26 = vld [vmem:[#allocation78_spill] sm:$0xff] }
 0x114   : > { %v1115_v63 = vrot.slane %v1114_v57, 2  ;;  %v1120_v42 = vsel %vm605_vm0, %v1043_v21, 0.0  ;;  %v1174_v0 = vmul.f32 %v1160_v7, %v2652_v14  ;;  %v1175_v47 = vmul.f32 %v1160_v7, %v2642_v56 }
 0x115   : > { %v1105_v17 = vadd.f32 %v1104_v53, %v1103_v25  ;;  %v1045_v52 = vmul.f32 %v2591_v51, %v3258_v13  ;;  %v1216_v12 = vsel %vm605_vm0, %v1172_v40, 0.0  ;;  %v1121_v44 = vadd.f32 %v1120_v42, %v1119_v22  ;;  %v3265_v22 = vld [vmem:[#allocation48_spill] sm:$0xff]  ;;  %v3266_v42 = vld [vmem:[#allocation63_spill] sm:$0xff] }
 0x116   : > { %v1116_v6 = vadd.f32 %v1115_v63, %v1114_v57  ;;  %v950_v8 = vmul.f32 %v2572_v49, %v3259_v11  ;;  %v989_v10 = vmul.f32 %v2747_v3, %v3260_v26  ;;  %v1122_v14 = vsel %vm605_vm0, %v1044_v29, 0.0 }
 0x117   : > { %1205 = vadd.xlane.f32.xlu0 %v1204_v16  ;;  %1217 = vadd.xlane.f32.xlu1 %v1216_v12  ;;  %v982_v56 = vmul.f32 %v2600_v54, %v3261_v4  ;;  %v2790_v43 = vadd.f32 %v2718_v50, %v2604_v60  ;;  %v955_v21 = vmul.f32 %v2743_v37, %v3262_v58  ;;  %v1222_v18 = vsel %vm605_vm0, %v1174_v0, 0.0  ;;  %v3271_v4 = vld [vmem:[#allocation62_spill] sm:$0xff] }
 0x118   : > { %v1169_v49 = vmul.f32 %v2714_v2, %v2481_v9  ;;  %v1173_v25 = vmul.f32 %v1159_v1, %v2467_v45  ;;  %v1123_v57 = vadd.f32 %v1122_v14, %v1121_v44  ;;  %v1225_v34 = vsel %vm605_vm0, %v1175_v47, 0.0  ;;  %v3264_v9 = vld [vmem:[#allocation60_spill] sm:$0xff] }
 0x119   : > { %v2800_v28 = vadd.f32 %v1105_v17, %v2417_v20  ;;  %v1124_v54 = vsel %vm605_vm0, %v1045_v52, 0.0  ;;  %v1117_v60 = vrot.slane %v1116_v6, 1  ;;  %v2803_v40 = vadd.f32 %v982_v56, %v950_v8  ;;  %v3268_v17 = vld [vmem:[#allocation69_spill] sm:$0xff]  ;;  %v3269_v52 = vld [vmem:[#allocation18_spill] sm:$0xff] }
 0x11a   : > { %v1125_v50 = vadd.f32 %v1124_v54, %v1123_v57  ;;  %v1047_v53 = vmul.f32 %v2790_v43, %v3263_v24  ;;  %v987_v45 = vmul.f32 %v2747_v3, %v3264_v9  ;;  %v2809_v2 = vadd.f32 %v988_v33, %v956_v23  ;;  %v3270_v8 = vld [vmem:[#allocation82_spill] sm:$0xff]  ;;  %v3272_v56 = vld [vmem:[#allocation61_spill] sm:$0xff]  ;;  %v3275_v54 = vld [vmem:[#allocation79_spill] sm:$0xff] }
 0x11b   : > { %v2811_v1 = vadd.f32 %v989_v10, %v957_v15  ;;  %1223 = vadd.xlane.f32.xlu0 %v1222_v18  ;;  %1226 = vadd.xlane.f32.xlu1 %v1225_v34  ;;  %v1207_v20 = vsel %vm605_vm0, %v1169_v49, 0.0  ;;  %v1176_v48 = vmul.f32 %v1160_v7, %v2517_v35  ;;  %v1046_v59 = vmul.f32 %v2803_v40, %v3265_v22  ;;  %v3267_v15 = vld [vmem:[#allocation64_spill] sm:$0xff]  ;;  %v3274_v18 = vld [vmem:[#allocation75_spill] sm:$0xff] }
 0x11c   : > { %v1126_v29 = vrot.slane %v1125_v50, 4  ;;  %v1219_v16 = vsel %vm605_vm0, %v1173_v25, 0.0  ;;  %v1178_v63 = vmul.f32 %v2800_v28, %v2676_v39  ;;  %v954_v23 = vmul.f32 %v2743_v37, %v3266_v42 }
 0x11d   : > { %v986_v33 = vmul.f32 %v2747_v3, %v3267_v15  ;;  %v1118_v0 = vadd.f32 %v1117_v60, %v1116_v6  ;;  %v1048_v35 = vmul.f32 %v2739_v36, %v3268_v17  ;;  %v1133_v13 = vsel %vm605_vm0, %v1047_v53, 0.0 }
 0x11e   : > { %v1127_v47 = vadd.f32 %v1126_v29, %v1125_v50  ;;  %v1177_v12 = vmul.f32 %v1160_v7, %v3269_v52  ;;  %v1132_v44 = vsel %vm605_vm0, %v1046_v59, 0.0  ;;  %v2831_v11 = vadd.f32 %v987_v45, %v955_v21  ;;  %v3273_v21 = vld [vmem:[#allocation83_spill] sm:$0xff] }
 0x11f   : > { %1208 = vadd.xlane.f32.xlu0 %v1207_v20  ;;  %1220 = vadd.xlane.f32.xlu1 %v1219_v16  ;;  %v2829_v39 = vadd.f32 %v986_v33, %v954_v23  ;;  %v1228_v37 = vsel %vm605_vm0, %v1176_v48, 0.0  ;;  %v1179_v3 = vmul.f32 %v2800_v28, %v2671_v27  ;;  %v1049_v26 = vmul.f32 %v2759_v46, %v3270_v8 }
 0x120   : > { %v1128_v6 = vrot.slane %v1127_v47, 2  ;;  %v1234_v10 = vsel %vm605_vm0, %v1178_v63, 0.0  ;;  %v1134_v14 = vadd.f32 %v1133_v13, %v1132_v44  ;;  %v1051_v58 = vmul.f32 %v2831_v11, %v3272_v56  ;;  %v3276_v13 = vld [vmem:[#allocation84_spill] sm:$0xff] }
 0x121   : > { %v1050_v7 = vmul.f32 %v2829_v39, %v3271_v4  ;;  %v1162_v49 = vadd.f32 %v1118_v0, %v3273_v21  ;;  %v1135_v57 = vsel %vm605_vm0, %v1048_v35, 0.0  ;;  %v1052_v27 = vmul.f32 %v2809_v2, %v3274_v18 }
 0x122   : > { %v1129_v25 = vadd.f32 %v1128_v6, %v1127_v47  ;;  %v1136_v34 = vadd.f32 %v1135_v57, %v1134_v14  ;;  %v1053_v60 = vmul.f32 %v2811_v1, %v3275_v54  ;;  %v1146_v24 = vsel %vm605_vm0, %v1051_v58, 0.0  ;;  %v3277_v58 = vld [vmem:[#allocation23_spill] sm:$0xff] }
 0x123   : > { %1229 = vadd.xlane.f32.xlu0 %v1228_v37  ;;  %1235 = vadd.xlane.f32.xlu1 %v1234_v10  ;;  %v1145_v50 = vsel %vm605_vm0, %v1050_v7, 0.0  ;;  %v1137_v9 = vsel %vm605_vm0, %v1049_v26, 0.0  ;;  %v1231_v20 = vsel %vm605_vm0, %v1177_v12, 0.0  ;;  %v1180_v48 = vmul.f32 %v2800_v28, %v2523_v19 }
 0x124   : > { %v1130_v53 = vrot.slane %v1129_v25, 1  ;;  %v1147_v45 = vadd.f32 %v1146_v24, %v1145_v50  ;;  %v1138_v29 = vadd.f32 %v1137_v9, %v1136_v34  ;;  %v1148_v22 = vsel %vm605_vm0, %v1052_v27, 0.0 }
 0x125   : > { %v1237_v59 = vsel %vm605_vm0, %v1179_v3, 0.0  ;;  %v1182_v16 = vmul.f32 %v1162_v49, %v2697_v61  ;;  %v1150_v15 = vsel %vm605_vm0, %v1053_v60, 0.0  ;;  %v1181_v0 = vmul.f32 %v2800_v28, %v2565_v31 }
 0x126   : > { %v1131_v63 = vadd.f32 %v1130_v53, %v1129_v25  ;;  %v1149_v42 = vadd.f32 %v1148_v22, %v1147_v45  ;;  %v1139_v23 = vrot.slane %v1138_v29, 4  ;;  %v1240_v19 = vsel %vm605_vm0, %v1180_v48, 0.0 }
 0x127   : > { %1238 = vadd.xlane.f32.xlu0 %v1237_v59  ;;  %1232 = vadd.xlane.f32.xlu1 %v1231_v20  ;;  %v1246_v17 = vsel %vm605_vm0, %v1182_v16, 0.0  ;;  %v1183_v35 = vmul.f32 %v1162_v49, %v2693_v30  ;;  %v1243_v6 = vsel %vm605_vm0, %v1181_v0, 0.0  ;;  %v1184_v31 = vmul.f32 %v1162_v49, %v2574_v55 }
 0x128   : > { %v1151_v33 = vadd.f32 %v1150_v15, %v1149_v42  ;;  %v1140_v47 = vadd.f32 %v1139_v23, %v1138_v29  ;;  %v1163_v61 = vadd.f32 %v1131_v63, %v3276_v13  ;;  %v1185_v26 = vmul.f32 %v1162_v49, %v2576_v38 }
 0x129   : > { %v1249_v3 = vsel %vm605_vm0, %v1183_v35, 0.0  ;;  %v1252_v4 = vsel %vm605_vm0, %v1184_v31, 0.0  ;;  %v3278_v0 = vlaneseq }
 0x12a   : > { %v1141_v52 = vrot.slane %v1140_v47, 2  ;;  %v1152_v12 = vrot.slane %v1151_v33, 4  ;;  %v1186_v28 = vmul.f32 %v1163_v61, %v2728_v41  ;;  %v1187_v56 = vmul.f32 %v1163_v61, %v2734_v5 }
 0x12b   : > { %1241 = vadd.xlane.f32.xlu0 %v1240_v19  ;;  %1247 = vadd.xlane.f32.xlu1 %v1246_v17  ;;  %v1255_v41 = vsel %vm605_vm0, %v1185_v26, 0.0  ;;  %v1188_v57 = vmul.f32 %v1163_v61, %v2586_v32  ;;  %v1189_v18 = vmul.f32 %v1163_v61, %v2591_v51 }
 0x12c   : > { %v1142_v44 = vadd.f32 %v1141_v52, %v1140_v47  ;;  %v1153_v37 = vadd.f32 %v1152_v12, %v1151_v33  ;;  %v1258_v7 = vsel %vm605_vm0, %v1186_v28, 0.0  ;;  %v1261_v25 = vsel %vm605_vm0, %v1187_v56, 0.0 }
 0x12d   : > { %v1264_v5 = vsel %vm605_vm0, %v1188_v57, 0.0  ;;  %v1267_v32 = vsel %vm605_vm0, %v1189_v18, 0.0  ;;  %v1360_v47 = vand.u32 127, %v3278_v0 }
 0x12e   : > { %v1143_v8 = vrot.slane %v1142_v44, 1  ;;  %v1154_v30 = vrot.slane %v1153_v37, 2 }
 0x12f   : > { %1250 = vadd.xlane.f32.xlu0 %v1249_v3  ;;  %1244 = vadd.xlane.f32.xlu1 %v1243_v6  ;;  %v1365_v35 = vadd.s32 4294967288, %v1360_v47  ;;  %v1372_v52 = vadd.s32 4294967280, %v1360_v47  ;;  %v1379_v12 = vadd.s32 4294967272, %v1360_v47 }
 0x130   : > { %v1144_v10 = vadd.f32 %v1143_v8, %v1142_v44  ;;  %v1155_v14 = vadd.f32 %v1154_v30, %v1153_v37  ;;  %v3279_v44 = vld [vmem:[#allocation5_spill] sm:$0xff] }
 0x131   : > { %v2899_v37 = vsub.s32 %v1360_v47, %v3279_v44  ;;  %v2902_v3 = vsub.s32 %v1365_v35, %v3279_v44 }
 0x132   : > { %v1164_v55 = vadd.f32 %v1144_v10, %v3277_v58  ;;  %v1156_v21 = vrot.slane %v1155_v14, 1  ;;  %v2907_v10 = vsub.s32 %v1372_v52, %v3279_v44 }
 0x133   : > { %1253 = vadd.xlane.f32.xlu0 %v1252_v4  ;;  %1259 = vadd.xlane.f32.xlu1 %v1258_v7  ;;  %v2910_v7 = vsub.s32 %v1379_v12, %v3279_v44 }
 0x134   : > { %v1190_v38 = vmul.f32 %v1164_v55, %v2803_v40  ;;  %v1157_v49 = vadd.f32 %v1156_v21, %v1155_v14  ;;  %v1191_v34 = vmul.f32 %v1164_v55, %v2790_v43  ;;  %v1192_v40 = vmul.f32 %v1164_v55, %v2739_v36 }
 0x136   : > { %v1270_v27 = vsel %vm605_vm0, %v1190_v38, 0.0  ;;  %v1165_v54 = vadd.f32 %v1157_v49, %v2594_v62  ;;  %v1273_v60 = vsel %vm605_vm0, %v1191_v34, 0.0  ;;  %v1276_v51 = vsel %vm605_vm0, %v1192_v40, 0.0 }
 0x137   : > { %1262 = vadd.xlane.f32.xlu0 %v1261_v25  ;;  %1256 = vadd.xlane.f32.xlu1 %v1255_v41  ;;  %v1193_v62 = vmul.f32 %v1164_v55, %v2759_v46 }
 0x138   : > { %v1194_v50 = vmul.f32 %v1165_v54, %v2829_v39  ;;  %v1195_v43 = vmul.f32 %v1165_v54, %v2831_v11  ;;  %v1196_v36 = vmul.f32 %v1165_v54, %v2809_v2  ;;  %v1197_v39 = vmul.f32 %v1165_v54, %v2811_v1 }
 0x139   : > { %v1279_v9 = vsel %vm605_vm0, %v1193_v62, 0.0 }
 0x13a   : > { %v1282_v24 = vsel %vm605_vm0, %v1194_v50, 0.0  ;;  %v1285_v53 = vsel %vm605_vm0, %v1195_v43, 0.0  ;;  %v1288_v45 = vsel %vm605_vm0, %v1196_v36, 0.0  ;;  %v1291_v20 = vsel %vm605_vm0, %v1197_v39, 0.0 }
 0x13b   : > { %1265 = vadd.xlane.f32.xlu0 %v1264_v5  ;;  %1271 = vadd.xlane.f32.xlu1 %v1270_v27 }
 0x13f   : > { %1274 = vadd.xlane.f32.xlu0 %v1273_v60  ;;  %1268 = vadd.xlane.f32.xlu1 %v1267_v32 }
 0x143   : > { %1277 = vadd.xlane.f32.xlu0 %v1276_v51  ;;  %1283 = vadd.xlane.f32.xlu1 %v1282_v24 }
 0x147   : > { %1286 = vadd.xlane.f32.xlu0 %v1285_v53  ;;  %1280 = vadd.xlane.f32.xlu1 %v1279_v9 }
 0x14b   : > { %1289 = vadd.xlane.f32.xlu0 %v1288_v45  ;;  %1292 = vadd.xlane.f32.xlu1 %v1291_v20 }
 0x196   : > { %v1200_v11 = vpop.xlane.xlu1 %1199  ;;  %v1203_v46 = vpop.xlane.xlu0 %1202 }
 0x197   : > { %v1295_v28 = vmul.f32 0.5, %v1200_v11  ;;  %v1296_v8 = vmul.f32 0.5, %v1203_v46 }
 0x199   : > { %v1364_v41 = vrot.slane %v1295_v28, %v2899_v37  ;;  %v1369_v25 = vrot.slane %v1296_v8, %v2902_v3 }
 0x19b   : > { %v1371_v50 = vsel %vm1370_vm1, %v1369_v25, %v1364_v41 }
 0x19c   : > { %v1215_v48 = vpop.xlane.xlu1 %1214  ;;  %v1212_v29 = vpop.xlane.xlu0 %1211 }
 0x19d   : > { %v1300_v30 = vmul.f32 0.5, %v1215_v48  ;;  %v1299_v26 = vmul.f32 0.5, %v1212_v29 }
 0x19f   : > { %v1393_v57 = vrot.slane %v1300_v30, %v2902_v3  ;;  %v1389_v38 = vrot.slane %v1299_v26, %v2899_v37 }
 0x1a0   : > { %v1218_v22 = vpop.xlane.xlu1 %1217  ;;  %v1206_v59 = vpop.xlane.xlu0 %1205 }
 0x1a1   : > { %v1301_v14 = vmul.f32 0.5, %v1218_v22  ;;  %v1297_v4 = vmul.f32 0.5, %v1206_v59  ;;  %v1394_v51 = vsel %vm1370_vm1, %v1393_v57, %v1389_v38 }
 0x1a3   : > { %v1398_v49 = vrot.slane %v1301_v14, %v2907_v10  ;;  %v1376_v18 = vrot.slane %v1297_v4, %v2907_v10 }
 0x1a4   : > { %v1227_v16 = vpop.xlane.xlu1 %1226  ;;  %v1224_v63 = vpop.xlane.xlu0 %1223 }
 0x1a5   : > { %v1304_v5 = vmul.f32 0.5, %v1227_v16  ;;  %v1303_v27 = vmul.f32 0.5, %v1224_v63  ;;  %v1399_v43 = vsel %vm1377_vm2, %v1398_v49, %v1394_v51  ;;  %v1378_v62 = vsel %vm1377_vm2, %v1376_v18, %v1371_v50 }
 0x1a7   : > { %v1412_v53 = vrot.slane %v1304_v5, %v2902_v3  ;;  %v1408_v9 = vrot.slane %v1303_v27, %v2899_v37 }
 0x1a8   : > { %v1221_v42 = vpop.xlane.xlu1 %1220  ;;  %v1209_v2 = vpop.xlane.xlu0 %1208 }
 0x1a9   : > { %v1302_v56 = vmul.f32 0.5, %v1221_v42  ;;  %v1298_v58 = vmul.f32 0.5, %v1209_v2  ;;  %v1413_v59 = vsel %vm1370_vm1, %v1412_v53, %v1408_v9 }
 0x1ab   : > { %v1403_v34 = vrot.slane %v1302_v56, %v2910_v7  ;;  %v1383_v54 = vrot.slane %v1298_v58, %v2910_v7 }
 0x1ac   : > { %v1236_v23 = vpop.xlane.xlu1 %1235  ;;  %v1230_v1 = vpop.xlane.xlu0 %1229 }
 0x1ad   : > { %v1305_v60 = vmul.f32 0.5, %v1230_v1  ;;  %v1404_v36 = vsel %vm1384_vm3, %v1403_v34, %v1399_v43  ;;  %v1385_v39 = vsel %vm1384_vm3, %v1383_v54, %v1378_v62  ;;  %v1307_v29 = vmul.f32 0.5, %v1236_v23 }
 0x1ae   : > { %v1520_v16 = vsel %vm1519_vm4, %v1404_v36, %v1385_v39 }
 0x1af   : > { %v1417_v45 = vrot.slane %v1305_v60, %v2907_v10  ;;  %v1427_v52 = vrot.slane %v1307_v29, %v2899_v37 }
 0x1b0   : > { %v1233_v15 = vpop.xlane.xlu1 %1232  ;;  %v1239_v33 = vpop.xlane.xlu0 %1238 }
 0x1b1   : > { %v1306_v24 = vmul.f32 0.5, %v1233_v15  ;;  %v1308_v20 = vmul.f32 0.5, %v1239_v33  ;;  %v1418_v42 = vsel %vm1377_vm2, %v1417_v45, %v1413_v59  ;;  %v306_v45 = vld [vmem:[%s289_s9] sm:$0xff] }
 0x1b3   : > { %v1422_v22 = vrot.slane %v1306_v24, %v2910_v7  ;;  %v1431_v2 = vrot.slane %v1308_v20, %v2902_v3 }
 0x1b4   : > { %v1248_v19 = vpop.xlane.xlu1 %1247  ;;  %v1242_v17 = vpop.xlane.xlu0 %1241 }
 0x1b5   : > { %v1311_v63 = vmul.f32 0.5, %v1248_v19  ;;  %v1309_v1 = vmul.f32 0.5, %v1242_v17  ;;  %v1423_v12 = vsel %vm1384_vm3, %v1422_v22, %v1418_v42  ;;  %v1432_v8 = vsel %vm1370_vm1, %v1431_v2, %v1427_v52 }
 0x1b6   : > { %v1522_v20 = vsel %vm1521_vm5, %v1423_v12, %v1520_v16  ;;  %v1294_v16 = vmul.f32 0.5, %v306_v45 }
 0x1b7   : > { %v1446_v28 = vrot.slane %v1311_v63, %v2899_v37  ;;  %v1436_v30 = vrot.slane %v1309_v1, %v2907_v10 }
 0x1b8   : > { %v1245_v13 = vpop.xlane.xlu1 %1244  ;;  %v1251_v61 = vpop.xlane.xlu0 %1250 }
 0x1b9   : > { %v1312_v11 = vmul.f32 0.5, %v1251_v61  ;;  %v1310_v33 = vmul.f32 0.5, %v1245_v13  ;;  %v1437_v34 = vsel %vm1377_vm2, %v1436_v30, %v1432_v8 }
 0x1bb   : > { %v1450_v0 = vrot.slane %v1312_v11, %v2902_v3  ;;  %v1441_v4 = vrot.slane %v1310_v33, %v2910_v7 }
 0x1bc   : > { %v2904_v6 = vpop.xlane.xlu1 %1259  ;;  %v1254_v31 = vpop.xlane.xlu0 %1253 }
 0x1bd   : > { %v1313_v15 = vmul.f32 0.5, %v1254_v31  ;;  %v1315_v17 = vmul.f32 0.5, %v2904_v6  ;;  %v1451_v56 = vsel %vm1370_vm1, %v1450_v0, %v1446_v28 }
 0x1bf   : > { %v1455_v26 = vrot.slane %v1313_v15, %v2907_v10  ;;  %v1465_v49 = vrot.slane %v1315_v17, %v2899_v37 }
 0x1c0   : > { %v1257_v55 = vpop.xlane.xlu1 %1256  ;;  %v1263_v21 = vpop.xlane.xlu0 %1262 }
 0x1c1   : > { %v1314_v47 = vmul.f32 0.5, %v1257_v55  ;;  %v1316_v23 = vmul.f32 0.5, %v1263_v21  ;;  %v1456_v54 = vsel %vm1377_vm2, %v1455_v26, %v1451_v56 }
 0x1c3   : > { %v1460_v58 = vrot.slane %v1314_v47, %v2910_v7  ;;  %v1469_v6 = vrot.slane %v1316_v23, %v2902_v3 }
 0x1c4   : > { %v1272_v32 = vpop.xlane.xlu1 %1271  ;;  %v1266_v40 = vpop.xlane.xlu0 %1265 }
 0x1c5   : > { %v1317_v19 = vmul.f32 0.5, %v1266_v40  ;;  %v1319_v14 = vmul.f32 0.5, %v1272_v32  ;;  %v1442_v40 = vsel %vm1384_vm3, %v1441_v4, %v1437_v34  ;;  %v1461_v50 = vsel %vm1384_vm3, %v1460_v58, %v1456_v54 }
 0x1c6   : > { %v1470_v51 = vsel %vm1370_vm1, %v1469_v6, %v1465_v49 }
 0x1c7   : > { %v1474_v41 = vrot.slane %v1317_v19, %v2907_v10  ;;  %v1484_v60 = vrot.slane %v1319_v14, %v2899_v37 }
 0x1c8   : > { %v1269_v46 = vpop.xlane.xlu1 %1268  ;;  %v1275_v48 = vpop.xlane.xlu0 %1274 }
 0x1c9   : > { %v1320_v44 = vmul.f32 0.5, %v1275_v48  ;;  %v1318_v13 = vmul.f32 0.5, %v1269_v46  ;;  %v1475_v53 = vsel %vm1377_vm2, %v1474_v41, %v1470_v51 }
 0x1cb   : > { %v1488_v25 = vrot.slane %v1320_v44, %v2902_v3  ;;  %v1479_v18 = vrot.slane %v1318_v13, %v2910_v7 }
 0x1cc   : > { %v1284_v35 = vpop.xlane.xlu1 %1283  ;;  %v1278_v61 = vpop.xlane.xlu0 %1277 }
 0x1cd   : > { %v1321_v31 = vmul.f32 0.5, %v1278_v61  ;;  %v1323_v5 = vmul.f32 0.5, %v1284_v35  ;;  %v1489_v9 = vsel %vm1370_vm1, %v1488_v25, %v1484_v60  ;;  %v1480_v11 = vsel %vm1384_vm3, %v1479_v18, %v1475_v53 }
 0x1cf   : > { %v1493_v27 = vrot.slane %v1321_v31, %v2907_v10  ;;  %v1503_v46 = vrot.slane %v1323_v5, %v2899_v37 }
 0x1d0   : > { %v1281_v55 = vpop.xlane.xlu1 %1280  ;;  %v1287_v21 = vpop.xlane.xlu0 %1286 }
 0x1d1   : > { %v1322_v57 = vmul.f32 0.5, %v1281_v55  ;;  %v1324_v38 = vmul.f32 0.5, %v1287_v21  ;;  %v1494_v48 = vsel %vm1377_vm2, %v1493_v27, %v1489_v9 }
 0x1d3   : > { %v1498_v32 = vrot.slane %v1322_v57, %v2910_v7  ;;  %v1507_v24 = vrot.slane %v1324_v38, %v2902_v3  ;;  %v1524_v3 = vsel %vm1523_vm6, %v1442_v40, %v1522_v20 }
 0x1d4   : > { %v1293_v43 = vpop.xlane.xlu1 %1292  ;;  %v1290_v62 = vpop.xlane.xlu0 %1289  ;;  %v1526_v63 = vsel %vm1525_vm7, %v1461_v50, %v1524_v3 }
 0x1d5   : > { %v1326_v36 = vmul.f32 0.5, %v1293_v43  ;;  %v1325_v39 = vmul.f32 0.5, %v1290_v62  ;;  %v1499_v29 = vsel %vm1384_vm3, %v1498_v32, %v1494_v48  ;;  %v1508_v42 = vsel %vm1370_vm1, %v1507_v24, %v1503_v46 }
 0x1d6   : > { %v1528_v2 = vsel %vm1527_vm8, %v1480_v11, %v1526_v63 }
 0x1d7   : > { %v1517_v22 = vrot.slane %v1326_v36, %v2910_v7  ;;  %v1512_v59 = vrot.slane %v1325_v39, %v2907_v10  ;;  %v1530_v1 = vsel %vm1529_vm9, %v1499_v29, %v1528_v2 }
 0x1d9   : > { %v1513_v37 = vsel %vm1377_vm2, %v1512_v59, %v1508_v42 }
 0x1da   : > { %v1518_v7 = vsel %vm1384_vm3, %v1517_v22, %v1513_v37 }
 0x1db   : > { %v1532_v10 = vsel %vm1531_vm10, %v1518_v7, %v1530_v1 }
 0x1dc   : > { %v1534_v15 = vadd.f32 %v1532_v10, %v1294_v16 }
 0x1de   : > { %1536 = vst.msk [vmem:[%s277_s11] sm:$0xff] %vm1535_vm11, %v1534_v15 }
 0x1df   : > { %1735 = shalt.err (!%p1732_p4)
}
 0x1e0   : > { %s1736_s26 = scalar_lea.hbm %s1549_s15, 128  ;;  %s1740_s8 = scalar_lea.hbm %s3025_s5, 256 }
 0x1e1   : > { %p1737_p7 = scmp.ne.s32.totalorder %s1549_s15, %s1736_s26  ;;  %p1741_p10 = scmp.lt.s32.totalorder %s1549_s15, %s3025_s5 }
 0x1e2   : > { %p1742_p11 = scmp.lt.s32.totalorder %s1740_s8, %s1736_s26 }
 0x1e3   : > { %p1738_p8 = pnand %p1737_p7, %p1855_p5 }
 0x1e4   : > { %p1743_p12 = por %p1742_p11, %p1741_p10 }
 0x1e5   : > { %p1739_p9 = pneg %p1738_p8 }
 0x1e7   : > { %p1744_p13 = pnand %p1743_p12, %p1739_p9 }
 0x1e9   : > { %1747 = shalt.err (!%p1744_p13)
}
 0x1ea   : > { %1678 = dma.vmem_to_hbm [thread:$0]  (%p1855_p5), %s1552_s12, 128, %s1549_s15, %s1538_s16  }
 0x1eb PF: > { %p1684_p0 = scmp.ge.s32.totalorder %s1782_s21, 2  ;;  %s1563_s6 = sand.u32 1, %s1770_s18  }
 0x1ec   : > { %s1564_s11 = scalar_lea.sflag [#allocation3], %s1563_s6 }
 0x1ed   : > { %p1681_p1 = pnand %p1684_p0, %p1859_p6 }
 0x1ef   : > { %p1682_p2 = pneg %p1681_p1 }
 0x1f1   : > { %1765 = dma.done.wait (%p1682_p2), %s1564_s11, 128  }
 0x1f2   : > { %1767 = vsyncadd (%p1682_p2), %s1564_s11, 4294967168  ;;  %p15_p3 = scmp.ge.s32.totalorder %s1842_s24, 4   ;;  %s3280_s18 = smov %s1774_s19 }
 0x1f3   : > { %s3281_s19 = smov %s1778_s20  ;;  %s3282_s20 = smov %s1853_s27 }
 0x1f4   : > { %s3283_s21 = smov %s1842_s24  ;;  %17 = sbr.rel (!%p15_p3) target bundleno = 3 (0x3), region = 87 }
 0x1f9   :  { %1569 = vsyncpa [#allocation3], 1 }
 0x1fa   :  { %1571 = vsyncpa [#allocation3 + $0x1], 1 }

</bundles_post_ra>
